<compile_context>
chip_gen: v5e
topology: v5e:2x2
jax: 0.10.0
libtpu: 0.0.40
codegen_flags: <defaults>
</compile_context>

<pallas_src>
import functools

import jax
import jax.numpy as jnp
from jax import lax
from jax.experimental import pallas as pl
from jax.experimental.pallas import tpu as pltpu


# ----------------------------- Pallas kernel ------------------------------ #
def lstm_fc_kernel(x_ref,        # (T*B, D)   time-major, flattened, compute dtype
                   w_ih0_ref,    # (D, 8H)    layer-0 input weights, gate-interleaved/scaled
                   b_all_ref,    # (1, 8H)    b0 (layer-0 cols) + b1 (layer-1 cols), scaled, f32
                   w_blk_ref,    # (2H, 8H)   wavefront block weight [[w_hh0,w_ih1],[0,w_hh1]]
                   w_fc_ref,     # (2H, OP)   fc weights (layer-0 rows are zero)
                   b_fc_ref,     # (1, OP)    fc bias, f32
                   out_ref,      # (B, OP)    f32
                   zbuf_ref,     # ((T+1)*B, 8H) scratch: hoisted projection + biases
                   *, seq_len, batch, hidden, cdt):
    T, B, H = seq_len, batch, hidden
    H2, G = 2 * H, 8 * H
    f32 = jnp.float32

    # ---- Hoisted layer-0 input projection for ALL timesteps (one MXU op). ----
    # Row block s holds: layer-0 gate pre-acts (x_s @ w_ih0 + b0) in the layer-0
    # columns and b1 in the layer-1 columns.  Row block T is pure bias (its
    # layer-0 half is never used).
    b_all = b_all_ref[...].astype(f32)                                   # (1, G)
    proj = jnp.dot(x_ref[...], w_ih0_ref[...], preferred_element_type=f32)
    zbuf_ref[pl.ds(0, T * B), :] = (proj + b_all).astype(cdt)
    zbuf_ref[pl.ds(T * B, B), :] = jnp.broadcast_to(b_all, (B, G)).astype(cdt)

    # Packed states: h = [h0 | h1], c = [c0 | c1]  (128 lanes each for H=64).
    h = jnp.zeros((B, H2), f32)
    c = jnp.zeros((B, H2), f32)

    # Wavefront recurrence: tick s advances layer 0 to step s and layer 1 to
    # step s-1 from ONE block matmul.  T is static -> fully unrolled so the LLO
    # scheduler sees the whole serial chain.
    for s in range(T + 1):
        if s == 0:
            # State is all-zero -> the matmul contributes nothing; skip it.
            z = zbuf_ref[pl.ds(0, B), :].astype(f32)
        else:
            # Read the block weight at its point of use (no hoisted SSA value
            # held live across the unrolled loop); MXU streams it from VMEM.
            fused = jnp.dot(h.astype(cdt), w_blk_ref[...],
                            preferred_element_type=f32)                  # (B, G)
            z = fused + zbuf_ref[pl.ds(s * B, B), :].astype(f32)

        # sigmoid(x) = 0.5*tanh(0.5*x) + 0.5; the 0.5 pre-scale on i/f/o was
        # folded into the weights/biases, so a single tanh covers every gate of
        # both layers.  All slices below are 128-lane aligned.
        t = jnp.tanh(z)
        i_g = 0.5 * t[:, 0 * H2:1 * H2] + 0.5        # [i0 | i1]
        f_g = 0.5 * t[:, 1 * H2:2 * H2] + 0.5        # [f0 | f1]
        g_g = t[:, 2 * H2:3 * H2]                    # [g0 | g1]
        o_g = 0.5 * t[:, 3 * H2:4 * H2] + 0.5        # [o0 | o1]

        c = f_g * c + i_g * g_g
        h = o_g * jnp.tanh(c)

        if s == 0:
            # Tick 0's layer-1 half is spurious (layer 1 really starts at tick 1
            # from zero state); zero it with a static lane mask.
            lane = lax.broadcasted_iota(jnp.int32, (B, H2), 1)
            keep_l0 = (lane < H).astype(f32)
            h = h * keep_l0
            c = c * keep_l0

    # fc(out[:, -1, :]) == fc(h1 at the final timestep).  w_fc's layer-0 rows
    # are zero, so the packed state feeds the MXU directly (no slicing), and the
    # 128-wide output slab stores lane-dense.
    out_ref[...] = (jnp.dot(h.astype(cdt), w_fc_ref[...], preferred_element_type=f32)
                    + b_fc_ref[...].astype(f32)).astype(out_ref.dtype)


# ------------------------------- wrapper ----------------------------------- #
def lstm_model_forward(x, params, hidden_size, *, compute_dtype=jnp.float32):
    """x: (B, T, D) float32.  Returns (B, output_size) float32.

    compute_dtype controls the MXU operand dtype (weights, x, hoisted-projection
    scratch, h fed to dots).  jnp.bfloat16 is recommended on v6e/v7x; gate/cell
    math and accumulation stay f32 either way.
    """
    B, T, D = x.shape
    H = hidden_size
    O = params["w_fc"].shape[0]

    H2 = 2 * H              # packed state width [layer0 | layer1] (128 for H=64)
    G = 8 * H               # fused gate width: 4 gate groups x 2 layers
    OP = 128                # lane-dense padded fc output width
    B_pad = max(8, ((B + 7) // 8) * 8)   # fill the f32 (8,128) sublane tile
    cdt = compute_dtype
    f32 = jnp.float32

    # ---- input: pad batch, go time-major, flatten (T, B_pad) -> T*B_pad rows ----
    x_p = jnp.zeros((B_pad, T, D), f32).at[:B].set(x.astype(f32))
    x_tb = jnp.transpose(x_p, (1, 0, 2)).reshape(T * B_pad, D).astype(cdt)

    # Fused gate-column layout (each block H lanes, everything 128-lane aligned):
    #   [ i0 i1 | f0 f1 | g0 g1 | o0 o1 ]
    # sigmoid(x) = 0.5*tanh(0.5*x) + 0.5  ->  pre-scale i/f/o columns by 0.5.
    GATE_SCALE = (0.5, 0.5, 1.0, 0.5)        # i, f, g, o

    def place(w, layer):
        """(K, 4H) gate-ordered [i f g o] -> (K, 8H) interleaved + scaled, f32."""
        w = w.astype(f32)
        out = jnp.zeros((w.shape[0], G), f32)
        for gi in range(4):
            dst = gi * H2 + layer * H
            out = out.at[:, dst:dst + H].set(
                GATE_SCALE[gi] * w[:, gi * H:(gi + 1) * H])
        return out

    # Hoisted layer-0 input projection weights.
    w_ih0_p = place(params["w_ih0"].T, layer=0).astype(cdt)              # (D, G)

    # Wavefront block weight: rows 0:H multiply h0 (layer-0 hh + layer-1 ih),
    # rows H:2H multiply h1 (layer-1 hh; layer-0 columns stay zero).
    w_blk = jnp.zeros((H2, G), f32)
    w_blk = w_blk.at[:H].set(place(params["w_hh0"].T, 0) + place(params["w_ih1"].T, 1))
    w_blk = w_blk.at[H:].set(place(params["w_hh1"].T, 1))
    w_blk = w_blk.astype(cdt)                                            # (2H, G)

    # Fused biases for both layers (scaled + interleaved like the gates).
    b_all = (place((params["b_ih0"] + params["b_hh0"]).reshape(1, 4 * H), 0)
             + place((params["b_ih1"] + params["b_hh1"]).reshape(1, 4 * H), 1))  # (1, G)

    # FC reads only the layer-1 half of the packed state (layer-0 rows zero).
    w_fc_p = jnp.zeros((H2, OP), f32).at[H:, :O].set(
        params["w_fc"].T.astype(f32)).astype(cdt)                        # (2H, OP)
    b_fc_p = jnp.zeros((1, OP), f32).at[0, :O].set(params["b_fc"].astype(f32))

    vmem = pl.BlockSpec(memory_space=pltpu.MemorySpace.VMEM)
    kernel = functools.partial(lstm_fc_kernel, seq_len=T, batch=B_pad,
                               hidden=H, cdt=cdt)

    out_p = pl.pallas_call(
        kernel,
        out_shape=jax.ShapeDtypeStruct((B_pad, OP), f32),
        in_specs=[vmem] * 6,
        out_specs=vmem,
        scratch_shapes=[pltpu.VMEM(((T + 1) * B_pad, G), cdt)],
    )(x_tb, w_ih0_p, b_all, w_blk, w_fc_p, b_fc_p)

    return out_p[:B, :O]


# --------------------------- pure-JAX reference ----------------------------- #
def lstm_model_reference(x, params, hidden_size):
    H = hidden_size
    B = x.shape[0]

    def cell(x_t, h, c, w_ih, w_hh, b_ih, b_hh):
        g = x_t @ w_ih.T + h @ w_hh.T + b_ih + b_hh
        i = jax.nn.sigmoid(g[:, 0 * H:1 * H])
        f = jax.nn.sigmoid(g[:, 1 * H:2 * H])
        gg = jnp.tanh(g[:, 2 * H:3 * H])
        o = jax.nn.sigmoid(g[:, 3 * H:4 * H])
        c_new = f * c + i * gg
        return o * jnp.tanh(c_new), c_new

    def scan_fn(carry, x_t):
        h0, c0, h1, c1 = carry
        h0, c0 = cell(x_t, h0, c0, params["w_ih0"], params["w_hh0"],
                      params["b_ih0"], params["b_hh0"])
        h1, c1 = cell(h0, h1, c1, params["w_ih1"], params["w_hh1"],
                      params["b_ih1"], params["b_hh1"])
        return (h0, c0, h1, c1), None

    z = jnp.zeros((B, H), jnp.float32)
    (h0, c0, h1, c1), _ = lax.scan(scan_fn, (z, z, z, z),
                                   jnp.transpose(x, (1, 0, 2)))
    return h1 @ params["w_fc"].T + params["b_fc"]


# --------------------------------- main ------------------------------------ #
if __name__ == "__main__":
    # Small shapes consistent with the module: num_layers=2, output_size=3,
    # hidden_size=64 (module default), input_size=8, batch=4, seq=8.
    B, T, D = 4, 8, 8
    H, O = 64, 3

    key = jax.random.PRNGKey(0)
    keys = jax.random.split(key, 11)
    k = 1.0 / jnp.sqrt(jnp.float32(H))   # PyTorch default init: U(-1/sqrt(H), 1/sqrt(H))

    def u(kk, shape):
        return jax.random.uniform(kk, shape, jnp.float32, -k, k)

    params = {
        "w_ih0": u(keys[0], (4 * H, D)),
        "w_hh0": u(keys[1], (4 * H, H)),
        "b_ih0": u(keys[2], (4 * H,)),
        "b_hh0": u(keys[3], (4 * H,)),
        "w_ih1": u(keys[4], (4 * H, H)),
        "w_hh1": u(keys[5], (4 * H, H)),
        "b_ih1": u(keys[6], (4 * H,)),
        "b_hh1": u(keys[7], (4 * H,)),
        "w_fc":  u(keys[8], (O, H)),
        "b_fc":  u(keys[9], (O,)),
    }

    x = jax.random.normal(keys[10], (B, T, D), jnp.float32)

    ref = lstm_model_reference(x, params, H)

    # f32 MXU operands (works on every generation).
    out = jax.block_until_ready(lstm_model_forward(x, params, H))
    assert out.shape == (B, O)
    assert jnp.allclose(out, ref, atol=1e-3, rtol=1e-3), (out, ref)

    # bf16 MXU operands (v6e/v7x-native; f32 accumulation) — looser tolerance.
    out_bf16 = jax.block_until_ready(
        lstm_model_forward(x, params, H, compute_dtype=jnp.bfloat16))
    assert jnp.allclose(out_bf16, ref, atol=5e-2, rtol=5e-2), (out_bf16, ref)

    print("KERNEL_OK")
</pallas_src>

<mosaic_0001>
module attributes {stable_mosaic.version = 11 : i64} {
  func.func @lstm_fc_kernel(%arg0: memref<64x8xf32, #tpu.memory_space<vmem>>, %arg1: memref<8x512xf32, #tpu.memory_space<vmem>>, %arg2: memref<1x512xf32, #tpu.memory_space<vmem>>, %arg3: memref<128x512xf32, #tpu.memory_space<vmem>>, %arg4: memref<128x128xf32, #tpu.memory_space<vmem>>, %arg5: memref<1x128xf32, #tpu.memory_space<vmem>>, %arg6: memref<8x128xf32, #tpu.memory_space<vmem>>, %arg7: memref<72x512xf32, #tpu.memory_space<vmem>>) attributes {dimension_semantics = [], scalar_prefetch = 0 : i64, scratch_operands = 1 : i64, tpu.core_type = #tpu.core_type<tc>} {
    %c0 = arith.constant 0 : index
    %c0_0 = arith.constant 0 : index
    %0 = vector.load %arg2[%c0, %c0_0] : memref<1x512xf32, #tpu.memory_space<vmem>>, vector<1x512xf32>
    %c0_1 = arith.constant 0 : index
    %c0_2 = arith.constant 0 : index
    %1 = vector.load %arg0[%c0_1, %c0_2] : memref<64x8xf32, #tpu.memory_space<vmem>>, vector<64x8xf32>
    %c0_3 = arith.constant 0 : index
    %c0_4 = arith.constant 0 : index
    %2 = vector.load %arg1[%c0_3, %c0_4] : memref<8x512xf32, #tpu.memory_space<vmem>>, vector<8x512xf32>
    %cst = arith.constant dense<0.000000e+00> : vector<64x512xf32>
    %3 = tpu.matmul %1, %2, %cst {dimension_numbers = #tpu.dot_dimension_numbers<[1], [0], [0], [1], [0, 0, 1, 1], [], []>} : vector<64x8xf32>, vector<8x512xf32>, vector<64x512xf32> -> vector<64x512xf32>
    %4 = vector.broadcast %0 : vector<1x512xf32> to vector<64x512xf32>
    %5 = arith.addf %3, %4 : vector<64x512xf32>
    %c0_5 = arith.constant 0 : index
    %c0_6 = arith.constant 0 : index
    %6 = vector.load %arg7[%c0_5, %c0_6] : memref<72x512xf32, #tpu.memory_space<vmem>>, vector<64x512xf32>
    tpu.vector_store %arg7[%c0_5, %c0_6], %5 {strides = array<i32>} : memref<72x512xf32, #tpu.memory_space<vmem>>, vector<64x512xf32>,
    %7 = vector.shape_cast %0 : vector<1x512xf32> to vector<1x512xf32>
    %8 = vector.broadcast %7 : vector<1x512xf32> to vector<8x512xf32>
    %c64 = arith.constant 64 : index
    %c0_7 = arith.constant 0 : index
    %9 = vector.load %arg7[%c64, %c0_7] : memref<72x512xf32, #tpu.memory_space<vmem>>, vector<8x512xf32>
    tpu.vector_store %arg7[%c64, %c0_7], %8 {strides = array<i32>} : memref<72x512xf32, #tpu.memory_space<vmem>>, vector<8x512xf32>,
    %cst_8 = arith.constant 0.000000e+00 : f32
    %10 = vector.broadcast %cst_8 : f32 to vector<8x128xf32>
    %c0_9 = arith.constant 0 : index
    %c0_10 = arith.constant 0 : index
    %11 = vector.load %arg7[%c0_9, %c0_10] : memref<72x512xf32, #tpu.memory_space<vmem>>, vector<8x512xf32>
    %12 = math.tanh %11 : vector<8x512xf32>
    %13 = vector.extract_strided_slice %12 {offsets = [0, 0], sizes = [8, 128], strides = [1, 1]} : vector<8x512xf32> to vector<8x128xf32>
    %cst_11 = arith.constant 5.000000e-01 : f32
    %14 = vector.broadcast %cst_11 : f32 to vector<8x128xf32>
    %15 = arith.mulf %14, %13 : vector<8x128xf32>
    %cst_12 = arith.constant 5.000000e-01 : f32
    %16 = vector.broadcast %cst_12 : f32 to vector<8x128xf32>
    %17 = arith.addf %15, %16 : vector<8x128xf32>
    %18 = vector.extract_strided_slice %12 {offsets = [0, 128], sizes = [8, 128], strides = [1, 1]} : vector<8x512xf32> to vector<8x128xf32>
    %cst_13 = arith.constant 5.000000e-01 : f32
    %19 = vector.broadcast %cst_13 : f32 to vector<8x128xf32>
    %20 = arith.mulf %19, %18 : vector<8x128xf32>
    %cst_14 = arith.constant 5.000000e-01 : f32
    %21 = vector.broadcast %cst_14 : f32 to vector<8x128xf32>
    %22 = arith.addf %20, %21 : vector<8x128xf32>
    %23 = vector.extract_strided_slice %12 {offsets = [0, 256], sizes = [8, 128], strides = [1, 1]} : vector<8x512xf32> to vector<8x128xf32>
    %24 = vector.extract_strided_slice %12 {offsets = [0, 384], sizes = [8, 128], strides = [1, 1]} : vector<8x512xf32> to vector<8x128xf32>
    %cst_15 = arith.constant 5.000000e-01 : f32
    %25 = vector.broadcast %cst_15 : f32 to vector<8x128xf32>
    %26 = arith.mulf %25, %24 : vector<8x128xf32>
    %cst_16 = arith.constant 5.000000e-01 : f32
    %27 = vector.broadcast %cst_16 : f32 to vector<8x128xf32>
    %28 = arith.addf %26, %27 : vector<8x128xf32>
    %29 = arith.mulf %22, %10 : vector<8x128xf32>
    %30 = arith.mulf %17, %23 : vector<8x128xf32>
    %31 = arith.addf %29, %30 : vector<8x128xf32>
    %32 = math.tanh %31 : vector<8x128xf32>
    %33 = arith.mulf %28, %32 : vector<8x128xf32>
    %34 = tpu.iota {dimensions = array<i32: 1>} : vector<8x128xi32>
    %c64_i32 = arith.constant 64 : i32
    %35 = vector.broadcast %c64_i32 : i32 to vector<8x128xi32>
    %36 = arith.cmpi slt, %34, %35 : vector<8x128xi32>
    %37 = arith.extui %36 : vector<8x128xi1> to vector<8x128xi32>
    %38 = arith.sitofp %37 : vector<8x128xi32> to vector<8x128xf32>
    %39 = arith.mulf %33, %38 : vector<8x128xf32>
    %40 = arith.mulf %31, %38 : vector<8x128xf32>
    %c0_17 = arith.constant 0 : index
    %c0_18 = arith.constant 0 : index
    %41 = vector.load %arg3[%c0_17, %c0_18] : memref<128x512xf32, #tpu.memory_space<vmem>>, vector<128x512xf32>
    %cst_19 = arith.constant dense<0.000000e+00> : vector<8x512xf32>
    %42 = tpu.matmul %39, %41, %cst_19 {dimension_numbers = #tpu.dot_dimension_numbers<[1], [0], [0], [1], [0, 0, 1, 1], [], []>} : vector<8x128xf32>, vector<128x512xf32>, vector<8x512xf32> -> vector<8x512xf32>
    %c8 = arith.constant 8 : index
    %c0_20 = arith.constant 0 : index
    %43 = vector.load %arg7[%c8, %c0_20] : memref<72x512xf32, #tpu.memory_space<vmem>>, vector<8x512xf32>
    %44 = arith.addf %42, %43 : vector<8x512xf32>
    %45 = math.tanh %44 : vector<8x512xf32>
    %46 = vector.extract_strided_slice %45 {offsets = [0, 0], sizes = [8, 128], strides = [1, 1]} : vector<8x512xf32> to vector<8x128xf32>
    %cst_21 = arith.constant 5.000000e-01 : f32
    %47 = vector.broadcast %cst_21 : f32 to vector<8x128xf32>
    %48 = arith.mulf %47, %46 : vector<8x128xf32>
    %cst_22 = arith.constant 5.000000e-01 : f32
    %49 = vector.broadcast %cst_22 : f32 to vector<8x128xf32>
    %50 = arith.addf %48, %49 : vector<8x128xf32>
    %51 = vector.extract_strided_slice %45 {offsets = [0, 128], sizes = [8, 128], strides = [1, 1]} : vector<8x512xf32> to vector<8x128xf32>
    %cst_23 = arith.constant 5.000000e-01 : f32
    %52 = vector.broadcast %cst_23 : f32 to vector<8x128xf32>
    %53 = arith.mulf %52, %51 : vector<8x128xf32>
    %cst_24 = arith.constant 5.000000e-01 : f32
    %54 = vector.broadcast %cst_24 : f32 to vector<8x128xf32>
    %55 = arith.addf %53, %54 : vector<8x128xf32>
    %56 = vector.extract_strided_slice %45 {offsets = [0, 256], sizes = [8, 128], strides = [1, 1]} : vector<8x512xf32> to vector<8x128xf32>
    %57 = vector.extract_strided_slice %45 {offsets = [0, 384], sizes = [8, 128], strides = [1, 1]} : vector<8x512xf32> to vector<8x128xf32>
    %cst_25 = arith.constant 5.000000e-01 : f32
    %58 = vector.broadcast %cst_25 : f32 to vector<8x128xf32>
    %59 = arith.mulf %58, %57 : vector<8x128xf32>
    %cst_26 = arith.constant 5.000000e-01 : f32
    %60 = vector.broadcast %cst_26 : f32 to vector<8x128xf32>
    %61 = arith.addf %59, %60 : vector<8x128xf32>
    %62 = arith.mulf %55, %40 : vector<8x128xf32>
    %63 = arith.mulf %50, %56 : vector<8x128xf32>
    %64 = arith.addf %62, %63 : vector<8x128xf32>
    %65 = math.tanh %64 : vector<8x128xf32>
    %66 = arith.mulf %61, %65 : vector<8x128xf32>
    %c0_27 = arith.constant 0 : index
    %c0_28 = arith.constant 0 : index
    %67 = vector.load %arg3[%c0_27, %c0_28] : memref<128x512xf32, #tpu.memory_space<vmem>>, vector<128x512xf32>
    %cst_29 = arith.constant dense<0.000000e+00> : vector<8x512xf32>
    %68 = tpu.matmul %66, %67, %cst_29 {dimension_numbers = #tpu.dot_dimension_numbers<[1], [0], [0], [1], [0, 0, 1, 1], [], []>} : vector<8x128xf32>, vector<128x512xf32>, vector<8x512xf32> -> vector<8x512xf32>
    %c16 = arith.constant 16 : index
    %c0_30 = arith.constant 0 : index
    %69 = vector.load %arg7[%c16, %c0_30] : memref<72x512xf32, #tpu.memory_space<vmem>>, vector<8x512xf32>
    %70 = arith.addf %68, %69 : vector<8x512xf32>
    %71 = math.tanh %70 : vector<8x512xf32>
    %72 = vector.extract_strided_slice %71 {offsets = [0, 0], sizes = [8, 128], strides = [1, 1]} : vector<8x512xf32> to vector<8x128xf32>
    %cst_31 = arith.constant 5.000000e-01 : f32
    %73 = vector.broadcast %cst_31 : f32 to vector<8x128xf32>
    %74 = arith.mulf %73, %72 : vector<8x128xf32>
    %cst_32 = arith.constant 5.000000e-01 : f32
    %75 = vector.broadcast %cst_32 : f32 to vector<8x128xf32>
    %76 = arith.addf %74, %75 : vector<8x128xf32>
    %77 = vector.extract_strided_slice %71 {offsets = [0, 128], sizes = [8, 128], strides = [1, 1]} : vector<8x512xf32> to vector<8x128xf32>
    %cst_33 = arith.constant 5.000000e-01 : f32
    %78 = vector.broadcast %cst_33 : f32 to vector<8x128xf32>
    %79 = arith.mulf %78, %77 : vector<8x128xf32>
    %cst_34 = arith.constant 5.000000e-01 : f32
    %80 = vector.broadcast %cst_34 : f32 to vector<8x128xf32>
    %81 = arith.addf %79, %80 : vector<8x128xf32>
    %82 = vector.extract_strided_slice %71 {offsets = [0, 256], sizes = [8, 128], strides = [1, 1]} : vector<8x512xf32> to vector<8x128xf32>
    %83 = vector.extract_strided_slice %71 {offsets = [0, 384], sizes = [8, 128], strides = [1, 1]} : vector<8x512xf32> to vector<8x128xf32>
    %cst_35 = arith.constant 5.000000e-01 : f32
    %84 = vector.broadcast %cst_35 : f32 to vector<8x128xf32>
    %85 = arith.mulf %84, %83 : vector<8x128xf32>
    %cst_36 = arith.constant 5.000000e-01 : f32
    %86 = vector.broadcast %cst_36 : f32 to vector<8x128xf32>
    %87 = arith.addf %85, %86 : vector<8x128xf32>
    %88 = arith.mulf %81, %64 : vector<8x128xf32>
    %89 = arith.mulf %76, %82 : vector<8x128xf32>
    %90 = arith.addf %88, %89 : vector<8x128xf32>
    %91 = math.tanh %90 : vector<8x128xf32>
    %92 = arith.mulf %87, %91 : vector<8x128xf32>
    %c0_37 = arith.constant 0 : index
    %c0_38 = arith.constant 0 : index
    %93 = vector.load %arg3[%c0_37, %c0_38] : memref<128x512xf32, #tpu.memory_space<vmem>>, vector<128x512xf32>
    %cst_39 = arith.constant dense<0.000000e+00> : vector<8x512xf32>
    %94 = tpu.matmul %92, %93, %cst_39 {dimension_numbers = #tpu.dot_dimension_numbers<[1], [0], [0], [1], [0, 0, 1, 1], [], []>} : vector<8x128xf32>, vector<128x512xf32>, vector<8x512xf32> -> vector<8x512xf32>
    %c24 = arith.constant 24 : index
    %c0_40 = arith.constant 0 : index
    %95 = vector.load %arg7[%c24, %c0_40] : memref<72x512xf32, #tpu.memory_space<vmem>>, vector<8x512xf32>
    %96 = arith.addf %94, %95 : vector<8x512xf32>
    %97 = math.tanh %96 : vector<8x512xf32>
    %98 = vector.extract_strided_slice %97 {offsets = [0, 0], sizes = [8, 128], strides = [1, 1]} : vector<8x512xf32> to vector<8x128xf32>
    %cst_41 = arith.constant 5.000000e-01 : f32
    %99 = vector.broadcast %cst_41 : f32 to vector<8x128xf32>
    %100 = arith.mulf %99, %98 : vector<8x128xf32>
    %cst_42 = arith.constant 5.000000e-01 : f32
    %101 = vector.broadcast %cst_42 : f32 to vector<8x128xf32>
    %102 = arith.addf %100, %101 : vector<8x128xf32>
    %103 = vector.extract_strided_slice %97 {offsets = [0, 128], sizes = [8, 128], strides = [1, 1]} : vector<8x512xf32> to vector<8x128xf32>
    %cst_43 = arith.constant 5.000000e-01 : f32
    %104 = vector.broadcast %cst_43 : f32 to vector<8x128xf32>
    %105 = arith.mulf %104, %103 : vector<8x128xf32>
    %cst_44 = arith.constant 5.000000e-01 : f32
    %106 = vector.broadcast %cst_44 : f32 to vector<8x128xf32>
    %107 = arith.addf %105, %106 : vector<8x128xf32>
    %108 = vector.extract_strided_slice %97 {offsets = [0, 256], sizes = [8, 128], strides = [1, 1]} : vector<8x512xf32> to vector<8x128xf32>
    %109 = vector.extract_strided_slice %97 {offsets = [0, 384], sizes = [8, 128], strides = [1, 1]} : vector<8x512xf32> to vector<8x128xf32>
    %cst_45 = arith.constant 5.000000e-01 : f32
    %110 = vector.broadcast %cst_45 : f32 to vector<8x128xf32>
    %111 = arith.mulf %110, %109 : vector<8x128xf32>
    %cst_46 = arith.constant 5.000000e-01 : f32
    %112 = vector.broadcast %cst_46 : f32 to vector<8x128xf32>
    %113 = arith.addf %111, %112 : vector<8x128xf32>
    %114 = arith.mulf %107, %90 : vector<8x128xf32>
    %115 = arith.mulf %102, %108 : vector<8x128xf32>
    %116 = arith.addf %114, %115 : vector<8x128xf32>
    %117 = math.tanh %116 : vector<8x128xf32>
    %118 = arith.mulf %113, %117 : vector<8x128xf32>
    %c0_47 = arith.constant 0 : index
    %c0_48 = arith.constant 0 : index
    %119 = vector.load %arg3[%c0_47, %c0_48] : memref<128x512xf32, #tpu.memory_space<vmem>>, vector<128x512xf32>
    %cst_49 = arith.constant dense<0.000000e+00> : vector<8x512xf32>
    %120 = tpu.matmul %118, %119, %cst_49 {dimension_numbers = #tpu.dot_dimension_numbers<[1], [0], [0], [1], [0, 0, 1, 1], [], []>} : vector<8x128xf32>, vector<128x512xf32>, vector<8x512xf32> -> vector<8x512xf32>
    %c32 = arith.constant 32 : index
    %c0_50 = arith.constant 0 : index
    %121 = vector.load %arg7[%c32, %c0_50] : memref<72x512xf32, #tpu.memory_space<vmem>>, vector<8x512xf32>
    %122 = arith.addf %120, %121 : vector<8x512xf32>
    %123 = math.tanh %122 : vector<8x512xf32>
    %124 = vector.extract_strided_slice %123 {offsets = [0, 0], sizes = [8, 128], strides = [1, 1]} : vector<8x512xf32> to vector<8x128xf32>
    %cst_51 = arith.constant 5.000000e-01 : f32
    %125 = vector.broadcast %cst_51 : f32 to vector<8x128xf32>
    %126 = arith.mulf %125, %124 : vector<8x128xf32>
    %cst_52 = arith.constant 5.000000e-01 : f32
    %127 = vector.broadcast %cst_52 : f32 to vector<8x128xf32>
    %128 = arith.addf %126, %127 : vector<8x128xf32>
    %129 = vector.extract_strided_slice %123 {offsets = [0, 128], sizes = [8, 128], strides = [1, 1]} : vector<8x512xf32> to vector<8x128xf32>
    %cst_53 = arith.constant 5.000000e-01 : f32
    %130 = vector.broadcast %cst_53 : f32 to vector<8x128xf32>
    %131 = arith.mulf %130, %129 : vector<8x128xf32>
    %cst_54 = arith.constant 5.000000e-01 : f32
    %132 = vector.broadcast %cst_54 : f32 to vector<8x128xf32>
    %133 = arith.addf %131, %132 : vector<8x128xf32>
    %134 = vector.extract_strided_slice %123 {offsets = [0, 256], sizes = [8, 128], strides = [1, 1]} : vector<8x512xf32> to vector<8x128xf32>
    %135 = vector.extract_strided_slice %123 {offsets = [0, 384], sizes = [8, 128], strides = [1, 1]} : vector<8x512xf32> to vector<8x128xf32>
    %cst_55 = arith.constant 5.000000e-01 : f32
    %136 = vector.broadcast %cst_55 : f32 to vector<8x128xf32>
    %137 = arith.mulf %136, %135 : vector<8x128xf32>
    %cst_56 = arith.constant 5.000000e-01 : f32
    %138 = vector.broadcast %cst_56 : f32 to vector<8x128xf32>
    %139 = arith.addf %137, %138 : vector<8x128xf32>
    %140 = arith.mulf %133, %116 : vector<8x128xf32>
    %141 = arith.mulf %128, %134 : vector<8x128xf32>
    %142 = arith.addf %140, %141 : vector<8x128xf32>
    %143 = math.tanh %142 : vector<8x128xf32>
    %144 = arith.mulf %139, %143 : vector<8x128xf32>
    %c0_57 = arith.constant 0 : index
    %c0_58 = arith.constant 0 : index
    %145 = vector.load %arg3[%c0_57, %c0_58] : memref<128x512xf32, #tpu.memory_space<vmem>>, vector<128x512xf32>
    %cst_59 = arith.constant dense<0.000000e+00> : vector<8x512xf32>
    %146 = tpu.matmul %144, %145, %cst_59 {dimension_numbers = #tpu.dot_dimension_numbers<[1], [0], [0], [1], [0, 0, 1, 1], [], []>} : vector<8x128xf32>, vector<128x512xf32>, vector<8x512xf32> -> vector<8x512xf32>
    %c40 = arith.constant 40 : index
    %c0_60 = arith.constant 0 : index
    %147 = vector.load %arg7[%c40, %c0_60] : memref<72x512xf32, #tpu.memory_space<vmem>>, vector<8x512xf32>
    %148 = arith.addf %146, %147 : vector<8x512xf32>
    %149 = math.tanh %148 : vector<8x512xf32>
    %150 = vector.extract_strided_slice %149 {offsets = [0, 0], sizes = [8, 128], strides = [1, 1]} : vector<8x512xf32> to vector<8x128xf32>
    %cst_61 = arith.constant 5.000000e-01 : f32
    %151 = vector.broadcast %cst_61 : f32 to vector<8x128xf32>
    %152 = arith.mulf %151, %150 : vector<8x128xf32>
    %cst_62 = arith.constant 5.000000e-01 : f32
    %153 = vector.broadcast %cst_62 : f32 to vector<8x128xf32>
    %154 = arith.addf %152, %153 : vector<8x128xf32>
    %155 = vector.extract_strided_slice %149 {offsets = [0, 128], sizes = [8, 128], strides = [1, 1]} : vector<8x512xf32> to vector<8x128xf32>
    %cst_63 = arith.constant 5.000000e-01 : f32
    %156 = vector.broadcast %cst_63 : f32 to vector<8x128xf32>
    %157 = arith.mulf %156, %155 : vector<8x128xf32>
    %cst_64 = arith.constant 5.000000e-01 : f32
    %158 = vector.broadcast %cst_64 : f32 to vector<8x128xf32>
    %159 = arith.addf %157, %158 : vector<8x128xf32>
    %160 = vector.extract_strided_slice %149 {offsets = [0, 256], sizes = [8, 128], strides = [1, 1]} : vector<8x512xf32> to vector<8x128xf32>
    %161 = vector.extract_strided_slice %149 {offsets = [0, 384], sizes = [8, 128], strides = [1, 1]} : vector<8x512xf32> to vector<8x128xf32>
    %cst_65 = arith.constant 5.000000e-01 : f32
    %162 = vector.broadcast %cst_65 : f32 to vector<8x128xf32>
    %163 = arith.mulf %162, %161 : vector<8x128xf32>
    %cst_66 = arith.constant 5.000000e-01 : f32
    %164 = vector.broadcast %cst_66 : f32 to vector<8x128xf32>
    %165 = arith.addf %163, %164 : vector<8x128xf32>
    %166 = arith.mulf %159, %142 : vector<8x128xf32>
    %167 = arith.mulf %154, %160 : vector<8x128xf32>
    %168 = arith.addf %166, %167 : vector<8x128xf32>
    %169 = math.tanh %168 : vector<8x128xf32>
    %170 = arith.mulf %165, %169 : vector<8x128xf32>
    %c0_67 = arith.constant 0 : index
    %c0_68 = arith.constant 0 : index
    %171 = vector.load %arg3[%c0_67, %c0_68] : memref<128x512xf32, #tpu.memory_space<vmem>>, vector<128x512xf32>
    %cst_69 = arith.constant dense<0.000000e+00> : vector<8x512xf32>
    %172 = tpu.matmul %170, %171, %cst_69 {dimension_numbers = #tpu.dot_dimension_numbers<[1], [0], [0], [1], [0, 0, 1, 1], [], []>} : vector<8x128xf32>, vector<128x512xf32>, vector<8x512xf32> -> vector<8x512xf32>
    %c48 = arith.constant 48 : index
    %c0_70 = arith.constant 0 : index
    %173 = vector.load %arg7[%c48, %c0_70] : memref<72x512xf32, #tpu.memory_space<vmem>>, vector<8x512xf32>
    %174 = arith.addf %172, %173 : vector<8x512xf32>
    %175 = math.tanh %174 : vector<8x512xf32>
    %176 = vector.extract_strided_slice %175 {offsets = [0, 0], sizes = [8, 128], strides = [1, 1]} : vector<8x512xf32> to vector<8x128xf32>
    %cst_71 = arith.constant 5.000000e-01 : f32
    %177 = vector.broadcast %cst_71 : f32 to vector<8x128xf32>
    %178 = arith.mulf %177, %176 : vector<8x128xf32>
    %cst_72 = arith.constant 5.000000e-01 : f32
    %179 = vector.broadcast %cst_72 : f32 to vector<8x128xf32>
    %180 = arith.addf %178, %179 : vector<8x128xf32>
    %181 = vector.extract_strided_slice %175 {offsets = [0, 128], sizes = [8, 128], strides = [1, 1]} : vector<8x512xf32> to vector<8x128xf32>
    %cst_73 = arith.constant 5.000000e-01 : f32
    %182 = vector.broadcast %cst_73 : f32 to vector<8x128xf32>
    %183 = arith.mulf %182, %181 : vector<8x128xf32>
    %cst_74 = arith.constant 5.000000e-01 : f32
    %184 = vector.broadcast %cst_74 : f32 to vector<8x128xf32>
    %185 = arith.addf %183, %184 : vector<8x128xf32>
    %186 = vector.extract_strided_slice %175 {offsets = [0, 256], sizes = [8, 128], strides = [1, 1]} : vector<8x512xf32> to vector<8x128xf32>
    %187 = vector.extract_strided_slice %175 {offsets = [0, 384], sizes = [8, 128], strides = [1, 1]} : vector<8x512xf32> to vector<8x128xf32>
    %cst_75 = arith.constant 5.000000e-01 : f32
    %188 = vector.broadcast %cst_75 : f32 to vector<8x128xf32>
    %189 = arith.mulf %188, %187 : vector<8x128xf32>
    %cst_76 = arith.constant 5.000000e-01 : f32
    %190 = vector.broadcast %cst_76 : f32 to vector<8x128xf32>
    %191 = arith.addf %189, %190 : vector<8x128xf32>
    %192 = arith.mulf %185, %168 : vector<8x128xf32>
    %193 = arith.mulf %180, %186 : vector<8x128xf32>
    %194 = arith.addf %192, %193 : vector<8x128xf32>
    %195 = math.tanh %194 : vector<8x128xf32>
    %196 = arith.mulf %191, %195 : vector<8x128xf32>
    %c0_77 = arith.constant 0 : index
    %c0_78 = arith.constant 0 : index
    %197 = vector.load %arg3[%c0_77, %c0_78] : memref<128x512xf32, #tpu.memory_space<vmem>>, vector<128x512xf32>
    %cst_79 = arith.constant dense<0.000000e+00> : vector<8x512xf32>
    %198 = tpu.matmul %196, %197, %cst_79 {dimension_numbers = #tpu.dot_dimension_numbers<[1], [0], [0], [1], [0, 0, 1, 1], [], []>} : vector<8x128xf32>, vector<128x512xf32>, vector<8x512xf32> -> vector<8x512xf32>
    %c56 = arith.constant 56 : index
    %c0_80 = arith.constant 0 : index
    %199 = vector.load %arg7[%c56, %c0_80] : memref<72x512xf32, #tpu.memory_space<vmem>>, vector<8x512xf32>
    %200 = arith.addf %198, %199 : vector<8x512xf32>
    %201 = math.tanh %200 : vector<8x512xf32>
    %202 = vector.extract_strided_slice %201 {offsets = [0, 0], sizes = [8, 128], strides = [1, 1]} : vector<8x512xf32> to vector<8x128xf32>
    %cst_81 = arith.constant 5.000000e-01 : f32
    %203 = vector.broadcast %cst_81 : f32 to vector<8x128xf32>
    %204 = arith.mulf %203, %202 : vector<8x128xf32>
    %cst_82 = arith.constant 5.000000e-01 : f32
    %205 = vector.broadcast %cst_82 : f32 to vector<8x128xf32>
    %206 = arith.addf %204, %205 : vector<8x128xf32>
    %207 = vector.extract_strided_slice %201 {offsets = [0, 128], sizes = [8, 128], strides = [1, 1]} : vector<8x512xf32> to vector<8x128xf32>
    %cst_83 = arith.constant 5.000000e-01 : f32
    %208 = vector.broadcast %cst_83 : f32 to vector<8x128xf32>
    %209 = arith.mulf %208, %207 : vector<8x128xf32>
    %cst_84 = arith.constant 5.000000e-01 : f32
    %210 = vector.broadcast %cst_84 : f32 to vector<8x128xf32>
    %211 = arith.addf %209, %210 : vector<8x128xf32>
    %212 = vector.extract_strided_slice %201 {offsets = [0, 256], sizes = [8, 128], strides = [1, 1]} : vector<8x512xf32> to vector<8x128xf32>
    %213 = vector.extract_strided_slice %201 {offsets = [0, 384], sizes = [8, 128], strides = [1, 1]} : vector<8x512xf32> to vector<8x128xf32>
    %cst_85 = arith.constant 5.000000e-01 : f32
    %214 = vector.broadcast %cst_85 : f32 to vector<8x128xf32>
    %215 = arith.mulf %214, %213 : vector<8x128xf32>
    %cst_86 = arith.constant 5.000000e-01 : f32
    %216 = vector.broadcast %cst_86 : f32 to vector<8x128xf32>
    %217 = arith.addf %215, %216 : vector<8x128xf32>
    %218 = arith.mulf %211, %194 : vector<8x128xf32>
    %219 = arith.mulf %206, %212 : vector<8x128xf32>
    %220 = arith.addf %218, %219 : vector<8x128xf32>
    %221 = math.tanh %220 : vector<8x128xf32>
    %222 = arith.mulf %217, %221 : vector<8x128xf32>
    %c0_87 = arith.constant 0 : index
    %c0_88 = arith.constant 0 : index
    %223 = vector.load %arg3[%c0_87, %c0_88] : memref<128x512xf32, #tpu.memory_space<vmem>>, vector<128x512xf32>
    %cst_89 = arith.constant dense<0.000000e+00> : vector<8x512xf32>
    %224 = tpu.matmul %222, %223, %cst_89 {dimension_numbers = #tpu.dot_dimension_numbers<[1], [0], [0], [1], [0, 0, 1, 1], [], []>} : vector<8x128xf32>, vector<128x512xf32>, vector<8x512xf32> -> vector<8x512xf32>
    %c64_90 = arith.constant 64 : index
    %c0_91 = arith.constant 0 : index
    %225 = vector.load %arg7[%c64_90, %c0_91] : memref<72x512xf32, #tpu.memory_space<vmem>>, vector<8x512xf32>
    %226 = arith.addf %224, %225 : vector<8x512xf32>
    %227 = math.tanh %226 : vector<8x512xf32>
    %228 = vector.extract_strided_slice %227 {offsets = [0, 0], sizes = [8, 128], strides = [1, 1]} : vector<8x512xf32> to vector<8x128xf32>
    %cst_92 = arith.constant 5.000000e-01 : f32
    %229 = vector.broadcast %cst_92 : f32 to vector<8x128xf32>
    %230 = arith.mulf %229, %228 : vector<8x128xf32>
    %cst_93 = arith.constant 5.000000e-01 : f32
    %231 = vector.broadcast %cst_93 : f32 to vector<8x128xf32>
    %232 = arith.addf %230, %231 : vector<8x128xf32>
    %233 = vector.extract_strided_slice %227 {offsets = [0, 128], sizes = [8, 128], strides = [1, 1]} : vector<8x512xf32> to vector<8x128xf32>
    %cst_94 = arith.constant 5.000000e-01 : f32
    %234 = vector.broadcast %cst_94 : f32 to vector<8x128xf32>
    %235 = arith.mulf %234, %233 : vector<8x128xf32>
    %cst_95 = arith.constant 5.000000e-01 : f32
    %236 = vector.broadcast %cst_95 : f32 to vector<8x128xf32>
    %237 = arith.addf %235, %236 : vector<8x128xf32>
    %238 = vector.extract_strided_slice %227 {offsets = [0, 256], sizes = [8, 128], strides = [1, 1]} : vector<8x512xf32> to vector<8x128xf32>
    %239 = vector.extract_strided_slice %227 {offsets = [0, 384], sizes = [8, 128], strides = [1, 1]} : vector<8x512xf32> to vector<8x128xf32>
    %cst_96 = arith.constant 5.000000e-01 : f32
    %240 = vector.broadcast %cst_96 : f32 to vector<8x128xf32>
    %241 = arith.mulf %240, %239 : vector<8x128xf32>
    %cst_97 = arith.constant 5.000000e-01 : f32
    %242 = vector.broadcast %cst_97 : f32 to vector<8x128xf32>
    %243 = arith.addf %241, %242 : vector<8x128xf32>
    %244 = arith.mulf %237, %220 : vector<8x128xf32>
    %245 = arith.mulf %232, %238 : vector<8x128xf32>
    %246 = arith.addf %244, %245 : vector<8x128xf32>
    %247 = math.tanh %246 : vector<8x128xf32>
    %248 = arith.mulf %243, %247 : vector<8x128xf32>
    %c0_98 = arith.constant 0 : index
    %c0_99 = arith.constant 0 : index
    %249 = vector.load %arg4[%c0_98, %c0_99] : memref<128x128xf32, #tpu.memory_space<vmem>>, vector<128x128xf32>
    %cst_100 = arith.constant dense<0.000000e+00> : vector<8x128xf32>
    %250 = tpu.matmul %248, %249, %cst_100 {dimension_numbers = #tpu.dot_dimension_numbers<[1], [0], [0], [1], [0, 0, 1, 1], [], []>} : vector<8x128xf32>, vector<128x128xf32>, vector<8x128xf32> -> vector<8x128xf32>
    %c0_101 = arith.constant 0 : index
    %c0_102 = arith.constant 0 : index
    %251 = vector.load %arg5[%c0_101, %c0_102] : memref<1x128xf32, #tpu.memory_space<vmem>>, vector<1x128xf32>
    %252 = vector.broadcast %251 : vector<1x128xf32> to vector<8x128xf32>
    %253 = arith.addf %250, %252 : vector<8x128xf32>
    %c0_103 = arith.constant 0 : index
    %c0_104 = arith.constant 0 : index
    %254 = vector.load %arg6[%c0_103, %c0_104] : memref<8x128xf32, #tpu.memory_space<vmem>>, vector<8x128xf32>
    tpu.vector_store %arg6[%c0_103, %c0_104], %253 {strides = array<i32>} : memref<8x128xf32, #tpu.memory_space<vmem>>, vector<8x128xf32>,
    return
  }
}

</mosaic_0001>

<bundles_post_ra>
// kernel: tpu_custom_call.1
= control target key start
LH: loop header
LB: loop body
LE: loop exit
PB: predicated region body
PF: predicated region fallthrough
CT: control target
= control target key end

     0   :  { %11 = vsyncpa [#allocation4], 0  ;;  %s2572_s0 = inlined_call_operand.vmem [shape: f32[64,8], index: 0, kind: input, shape index: {}]   ;;  %s2573_s1 = inlined_call_operand.vmem [shape: f32[8,512], index: 1, kind: input, shape index: {}]   ;;  %s2574_s2 = inlined_call_operand.vmem [shape: f32[1,512], index: 2, kind: input, shape index: {}]   ;;  %s2575_s3 = inlined_call_operand.hbm [shape: f32[128,512], index: 3, kind: input, shape index: {}]   ;;  %s2576_s4 = inlined_call_operand.hbm [shape: f32[128,128], index: 4, kind: input, shape index: {}]   ;;  %s2577_s5 = inlined_call_operand.vmem [shape: f32[1,128], index: 5, kind: input, shape index: {}]   ;;  %s2578_s6 = inlined_call_operand.hbm [shape: f32[8,128], index: 6, kind: output, shape index: {}]  }
   0x1   :  { %12 = vsyncpa [#allocation7], 0 }
   0x2   :  { %13 = vsyncpa [#allocation5], 0  ;;  %s24_s23 = sshll.u32 %s2575_s3, 4  ;;  %s1521_s24 = smov [#allocation3]   ;;  %s25_s23 = int_to_ptr.hbm [resolvable:$true] %s24_s23 }
   0x3   :  { %s26_s25 = sshll.u32 %s1521_s24, 4  ;;  %s37_s28 = sshll.u32 %s2576_s4, 4  ;;  %s27_s25 = int_to_ptr.vmem [resolvable:$true] %s26_s25  ;;  %s38_s28 = int_to_ptr.hbm [resolvable:$true] %s37_s28 }
   0x4   :  { %s1522_s29 = smov 512   ;;  %s1523_s30 = smov 32  }
   0x5   :  { %32 = dma.hbm_to_vmem [thread:$0]  %s25_s23, 8192, %s27_s25, [#allocation4], %s1522_s29, %s1522_s29, %s1523_s30  }
   0x6   :  { %s1524_s7 = smov [#allocation6]   ;;  %s1525_s9 = smov 128  }
   0x7   :  { %s39_s8 = sshll.u32 %s1524_s7, 4  ;;  %s1526_s10 = smov 8   ;;  %s40_s8 = int_to_ptr.vmem [resolvable:$true] %s39_s8 }
   0x8   :  { %45 = dma.hbm_to_vmem [thread:$0]  %s38_s28, 2048, %s40_s8, [#allocation7], %s1525_s9, %s1525_s9, %s1526_s10  }
   0x9   :  { %1515 = dma.done.wait [#allocation4], 8192  }
   0xa   :  { %1516 = vsyncadd [#allocation4], 4294959104 }
   0xb   :  { %1517 = dma.done.wait [#allocation7], 2048  }
   0xc   :  { %1518 = vsyncadd [#allocation7], 4294965248  ;;  %vm78_vm0 = vcmask 64512   ;;  %v65_v0 = vld [vmem:[%s2573_s1] sm:$0xff]  ;;  %v1576_v1 = vld [vmem:[%s2572_s0 + $0x30] sm:$0xff]  ;;  %s1528_s10 = smov [#allocation8]  }
   0xd   :  { %v67_v2 = vld [vmem:[%s2573_s1 + $0x10] sm:$0xff]  ;;  %1278 = vmatpush.msra.mxu2 %v65_v0  ;;  %1277 = vmatpush.msra.mxu1 %v65_v0  ;;  %v1584_v3 = vld [vmem:[%s2572_s0 + $0x28] sm:$0xff]  ;;  %v1596_v5 = vld [vmem:[%s2572_s0 + $0x38] sm:$0xff]  ;;  %s1231_s3 = sshll.u32 %s1528_s10, 4  ;;  %s1233_s12 = sshll.u32 %s2578_s6, 4  ;;  %s1232_s3 = int_to_ptr.vmem [resolvable:$true] %s1231_s3  ;;  %s1234_s12 = int_to_ptr.hbm [resolvable:$true] %s1233_s12 }
   0xe   :  { %v66_v4 = vld [vmem:[%s2573_s1 + $0x8] sm:$0xff]  ;;  %1250 = vmatmul.msk.f32.vlgmr.msra.gmra.mxu2 %vm78_vm0, %v1576_v1  ;;  %1249 = vmatmul.msk.f32.vlgmr.msra.gmra.mxu1 %vm78_vm0, %v1584_v3  ;;  %v68_v6 = vld [vmem:[%s2573_s1 + $0x18] sm:$0xff]  ;;  %v1601_v7 = vld [vmem:[#allocation3 + $0x1f0] sm:$0xff] }
   0xf   :  { %200 = vmatpush.msrb.mxu2 %v67_v2  ;;  %159 = vmatpush.msrb.mxu1 %v66_v4  ;;  %v57_v8 = vld [vmem:[%s2572_s0] sm:$0xff]  ;;  %v1606_v9 = vld [vmem:[#allocation3 + $0x1e8] sm:$0xff]  ;;  %v1608_v10 = vld [vmem:[#allocation3 + $0x1f8] sm:$0xff] }
  0x10   :  { %1279 = vmatpush.msra.mxu3 %v65_v0  ;;  %118 = vmatpush.msra.mxu0 %v65_v0  ;;  %2682 = vst [vmem:[#allocation12_spill] sm:$0xff] %v1608_v10  ;;  %v1613_v11 = vld [vmem:[#allocation3 + $0x1d0] sm:$0xff]  ;;  %v1616_v12 = vld [vmem:[#allocation3 + $0x1c8] sm:$0xff]  ;;  %v1618_v13 = vld [vmem:[#allocation3 + $0x1d8] sm:$0xff] }
  0x11   :  { %1251 = vmatmul.msk.f32.vlgmr.msra.gmra.mxu3 %vm78_vm0, %v1596_v5  ;;  %1244 = vmatmul.msk.f32.vlgmr.msra.gmra.mxu0 %vm78_vm0, %v57_v8  ;;  %2683 = vst [vmem:[#allocation13_spill] sm:$0xff] %v1618_v13  ;;  %v1623_v14 = vld [vmem:[#allocation3 + $0x1b0] sm:$0xff]  ;;  %v1625_v15 = vld [vmem:[#allocation3 + $0x1a8] sm:$0xff]  ;;  %v1629_v16 = vld [vmem:[#allocation3 + $0x1b8] sm:$0xff] }
  0x12   :  { %241 = vmatpush.msrb.mxu3 %v68_v6  ;;  %437 = vmatpush.msra.mxu2 %v1601_v7  ;;  %2684 = vst [vmem:[#allocation14_spill] sm:$0xff] %v1623_v14  ;;  %v1631_v17 = vld [vmem:[#allocation3 + $0x1e0] sm:$0xff]  ;;  %v1635_v18 = vld [vmem:[#allocation3 + $0x190] sm:$0xff]  ;;  %v1639_v19 = vld [vmem:[#allocation3 + $0x188] sm:$0xff] }
  0x13   :  { %417 = vmatpush.msra.mxu1 %v1606_v9  ;;  %2685 = vst [vmem:[#allocation15_spill] sm:$0xff] %v1625_v15  ;;  %v1641_v20 = vld [vmem:[#allocation3 + $0x198] sm:$0xff]  ;;  %v1644_v21 = vld [vmem:[#allocation3 + $0x170] sm:$0xff]  ;;  %397 = vmatpush.msrb.mxu0 %v1631_v17  ;;  %v1649_v22 = vld [vmem:[#allocation3 + $0x168] sm:$0xff] }
  0x14   :  { %457 = vmatpush.msra.mxu3 %v1608_v10  ;;  %438 = vmatpush.msra.mxu2 %v1613_v11  ;;  %2686 = vst [vmem:[#allocation16_spill] sm:$0xff] %v1629_v16  ;;  %v1651_v23 = vld [vmem:[#allocation3 + $0x178] sm:$0xff]  ;;  %v58_v24 = vld [vmem:[%s2572_s0 + $0x8] sm:$0xff]  ;;  %v1658_v25 = vld [vmem:[#allocation3 + $0x150] sm:$0xff] }
  0x15   :  { %418 = vmatpush.msra.mxu1 %v1616_v12  ;;  %v1663_v26 = vld [vmem:[#allocation3 + $0x148] sm:$0xff]  ;;  %v1666_v27 = vld [vmem:[#allocation3 + $0x130] sm:$0xff]  ;;  %v60_v30 = vld [vmem:[%s2572_s0 + $0x18] sm:$0xff] }
  0x16   :  { %458 = vmatpush.msra.mxu3 %v1618_v13  ;;  %1260 = vmatmul.msk.f32.vlgmr.msrb.gmra.mxu2 %vm78_vm0, %v57_v8  ;;  %v1671_v28 = vld [vmem:[#allocation3 + $0x128] sm:$0xff]  ;;  %v59_v29 = vld [vmem:[%s2572_s0 + $0x10] sm:$0xff]  ;;  %v1691_v31 = vld [vmem:[#allocation3 + $0x158] sm:$0xff] }
  0x17   :  { %1252 = vmatmul.msk.f32.vlgmr.msrb.gmra.mxu1 %vm78_vm0, %v57_v8  ;;  %439 = vmatpush.msra.mxu2 %v1623_v14  ;;  %v1693_v32 = vld [vmem:[#allocation3 + $0x110] sm:$0xff]  ;;  %v1695_v33 = vld [vmem:[#allocation3 + $0x1c0] sm:$0xff]  ;;  %v1699_v34 = vld [vmem:[#allocation3 + $0x108] sm:$0xff] }
  0x18   :  { %419 = vmatpush.msra.mxu1 %v1625_v15  ;;  %459 = vmatpush.msra.mxu3 %v1629_v16  ;;  %v61_v35 = vld [vmem:[%s2572_s0 + $0x20] sm:$0xff]  ;;  %v1708_v37 = vld [vmem:[#allocation3 + $0x138] sm:$0xff]  ;;  %v1712_v38 = vld [vmem:[#allocation3 + $0xf0] sm:$0xff] }
  0x19   :  { %1268 = vmatmul.msk.f32.vlgmr.msrb.gmra.mxu3 %vm78_vm0, %v57_v8  ;;  %440 = vmatpush.msra.mxu2 %v1635_v18  ;;  %v1706_v36 = vld [vmem:[#allocation3 + $0x1a0] sm:$0xff]  ;;  %v1718_v40 = vld [vmem:[#allocation3 + $0xe8] sm:$0xff]  ;;  %v1740_v44 = vld [vmem:[#allocation3 + $0x118] sm:$0xff] }
  0x1a   :  { %420 = vmatpush.msra.mxu1 %v1639_v19  ;;  %460 = vmatpush.msra.mxu3 %v1641_v20  ;;  %v1716_v39 = vld [vmem:[#allocation3 + $0x180] sm:$0xff]  ;;  %v1745_v46 = vld [vmem:[#allocation3 + $0xd0] sm:$0xff]  ;;  %v1747_v47 = vld [vmem:[#allocation3 + $0xc8] sm:$0xff] }
  0x1b   :  { %441 = vmatpush.msra.mxu2 %v1644_v21  ;;  %1245 = vmatmul.msk.f32.gmra.mxu0 %vm78_vm0, %v58_v24  ;;  %v1725_v41 = vld [vmem:[#allocation3 + $0x160] sm:$0xff]  ;;  %v1752_v48 = vld [vmem:[#allocation3 + $0xf8] sm:$0xff]  ;;  %v1768_v52 = vld [vmem:[#allocation3 + $0xb0] sm:$0xff] }
  0x1c   :  { %421 = vmatpush.msra.mxu1 %v1649_v22  ;;  %461 = vmatpush.msra.mxu3 %v1651_v23  ;;  %v1732_v42 = vld [vmem:[#allocation3 + $0x140] sm:$0xff]  ;;  %v1758_v50 = vld [vmem:[#allocation3 + $0xd8] sm:$0xff]  ;;  %2687 = vst [vmem:[#allocation17_spill] sm:$0xff] %v1768_v52  ;;  %v1770_v53 = vld [vmem:[#allocation3 + $0xa8] sm:$0xff] }
  0x1d   :  { %442 = vmatpush.msra.mxu2 %v1658_v25  ;;  %398 = vmatpush.msrb.mxu0 %v1695_v33  ;;  %v1737_v43 = vld [vmem:[#allocation3 + $0x120] sm:$0xff]  ;;  %v1772_v54 = vld [vmem:[#allocation3 + $0xb8] sm:$0xff]  ;;  %v1778_v55 = vld [vmem:[#allocation3 + $0x90] sm:$0xff] }
  0x1e   :  { %1261 = vmatmul.msk.f32.gmra.mxu2 %vm78_vm0, %v58_v24  ;;  %422 = vmatpush.msra.mxu1 %v1663_v26  ;;  %v1742_v45 = vld [vmem:[#allocation3 + $0x100] sm:$0xff]  ;;  %2688 = vst [vmem:[#allocation18_spill] sm:$0xff] %v1772_v54  ;;  %v1782_v57 = vld [vmem:[#allocation3 + $0x88] sm:$0xff]  ;;  %v1786_v58 = vld [vmem:[#allocation3 + $0x98] sm:$0xff] }
  0x1f   :  { %1253 = vmatmul.msk.f32.gmra.mxu1 %vm78_vm0, %v58_v24  ;;  %443 = vmatpush.msra.mxu2 %v1666_v27  ;;  %v1754_v49 = vld [vmem:[#allocation3 + $0xe0] sm:$0xff]  ;;  %2689 = vst [vmem:[#allocation19_spill] sm:$0xff] %v1778_v55  ;;  %v1795_v61 = vld [vmem:[#allocation3 + $0x70] sm:$0xff]  ;;  %v1797_v62 = vld [vmem:[#allocation3 + $0x68] sm:$0xff] }
  0x20   :  { %423 = vmatpush.msra.mxu1 %v1671_v28  ;;  %462 = vmatpush.msra.mxu3 %v1691_v31  ;;  %v1764_v51 = vld [vmem:[#allocation3 + $0xc0] sm:$0xff]  ;;  %2690 = vst [vmem:[#allocation20_spill] sm:$0xff] %v1782_v57  ;;  %v1801_v63 = vld [vmem:[#allocation3 + $0x78] sm:$0xff]  ;;  %v1809_v2 = vld [vmem:[#allocation3 + $0x48] sm:$0xff] }
  0x21   :  { %1269 = vmatmul.msk.f32.gmra.mxu3 %vm78_vm0, %v58_v24  ;;  %444 = vmatpush.msra.mxu2 %v1693_v32  ;;  %v1780_v56 = vld [vmem:[#allocation3 + $0xa0] sm:$0xff]  ;;  %2691 = vst [vmem:[#allocation21_spill] sm:$0xff] %v1786_v58  ;;  %v1820_v6 = vld [vmem:[#allocation3 + $0x58] sm:$0xff]  ;;  %v1826_v24 = vld [vmem:[#allocation3 + $0x30] sm:$0xff] }
  0x22   :  { %424 = vmatpush.msra.mxu1 %v1699_v34  ;;  %399 = vmatpush.msrb.mxu0 %v1706_v36  ;;  %v1788_v59 = vld [vmem:[#allocation3 + $0x80] sm:$0xff]  ;;  %2693 = vst [vmem:[#allocation23_spill] sm:$0xff] %v1795_v61 }
  0x23   :  { %1246 = vmatmul.msk.f32.gmra.mxu0 %vm78_vm0, %v59_v29  ;;  %463 = vmatpush.msra.mxu3 %v1708_v37  ;;  %2692 = vst [vmem:[#allocation22_spill] sm:$0xff] %v1788_v59  ;;  %v56_v60 = vld [vmem:[%s2574_s2] sm:$0xf] }
  0x24   :  { %445 = vmatpush.msra.mxu2 %v1712_v38  ;;  %400 = vmatpush.msrb.mxu0 %v1716_v39  ;;  %2694 = vst [vmem:[#allocation24_spill] sm:$0xff] %v1797_v62  ;;  %v1816_v4 = vperm.slane %v56_v60, 0 }
  0x25   :  { %425 = vmatpush.msra.mxu1 %v1718_v40  ;;  %464 = vmatpush.msra.mxu3 %v1740_v44  ;;  %2695 = vst [vmem:[#allocation25_spill] sm:$0xff] %v1801_v63 }
  0x26   :  { %1262 = vmatmul.msk.f32.gmra.mxu2 %vm78_vm0, %v59_v29  ;;  %401 = vmatpush.msrb.mxu0 %v1725_v41  ;;  %2698 = vst [vmem:[#allocation28_spill] sm:$0xff] %v1809_v2 }
  0x27   :  { %1254 = vmatmul.msk.f32.gmra.mxu1 %vm78_vm0, %v59_v29  ;;  %446 = vmatpush.msra.mxu2 %v1745_v46  ;;  %2700 = vst [vmem:[#allocation30_spill] sm:$0xff] %v1816_v4 }
  0x28   :  { %402 = vmatpush.msrb.mxu0 %v1732_v42  ;;  %426 = vmatpush.msra.mxu1 %v1747_v47  ;;  %2701 = vst [vmem:[#allocation31_spill] sm:$0xff] %v1820_v6 }
  0x29   :  { %1270 = vmatmul.msk.f32.gmra.mxu3 %vm78_vm0, %v59_v29  ;;  %447 = vmatpush.msra.mxu2 %v1768_v52  ;;  %2702 = vst [vmem:[#allocation32_spill] sm:$0xff] %v1826_v24  ;;  %v1828_v29 = vld [vmem:[#allocation3 + $0x28] sm:$0xff] }
  0x2a   :  { %403 = vmatpush.msrb.mxu0 %v1737_v43  ;;  %465 = vmatpush.msra.mxu3 %v1752_v48  ;;  %2703 = vst [vmem:[#allocation33_spill] sm:$0xff] %v1828_v29 }
  0x2b   :  { %1247 = vmatmul.msk.f32.gmra.mxu0 %vm78_vm0, %v60_v30  ;;  %427 = vmatpush.msra.mxu1 %v1770_v53 }
  0x2c   :  { %404 = vmatpush.msrb.mxu0 %v1742_v45  ;;  %466 = vmatpush.msra.mxu3 %v1758_v50 }
  0x2d   :  { %448 = vmatpush.msra.mxu2 %v1778_v55  ;;  %428 = vmatpush.msra.mxu1 %v1782_v57 }
  0x2e   :  { %1263 = vmatmul.msk.f32.gmra.mxu2 %vm78_vm0, %v60_v30  ;;  %405 = vmatpush.msrb.mxu0 %v1754_v49 }
  0x2f   :  { %1255 = vmatmul.msk.f32.gmra.mxu1 %vm78_vm0, %v60_v30  ;;  %467 = vmatpush.msra.mxu3 %v1772_v54 }
  0x30   :  { %406 = vmatpush.msrb.mxu0 %v1764_v51  ;;  %449 = vmatpush.msra.mxu2 %v1795_v61 }
  0x31   :  { %1271 = vmatmul.msk.f32.gmra.mxu3 %vm78_vm0, %v60_v30  ;;  %429 = vmatpush.msra.mxu1 %v1797_v62  ;;  %v1830_v30 = vld [vmem:[#allocation3 + $0x40] sm:$0xff] }
  0x32   :  { %407 = vmatpush.msrb.mxu0 %v1780_v56  ;;  %468 = vmatpush.msra.mxu3 %v1786_v58  ;;  %2704 = vst [vmem:[#allocation34_spill] sm:$0xff] %v1830_v30 }
  0x33   :  { %1248 = vmatmul.msk.f32.gmra.mxu0 %vm78_vm0, %v61_v35  ;;  %430 = vmatpush.msra.mxu1 %v1809_v2  ;;  %v1843_v2 = vld [vmem:[#allocation3 + $0x20] sm:$0xff] }
  0x34   :  { %408 = vmatpush.msrb.mxu0 %v1788_v59  ;;  %469 = vmatpush.msra.mxu3 %v1801_v63  ;;  %2708 = vst [vmem:[#allocation38_spill] sm:$0xff] %v1843_v2  ;;  %v1845_v63 = vld [vmem:[#allocation3 + $0x8] sm:$0xff] }
  0x35   :  { %431 = vmatpush.msra.mxu1 %v1828_v29  ;;  %2709 = vst [vmem:[#allocation39_spill] sm:$0xff] %v1845_v63 }
  0x36   :  { %1264 = vmatmul.msk.f32.gmra.mxu2 %vm78_vm0, %v61_v35  ;;  %470 = vmatpush.msra.mxu3 %v1820_v6 }
  0x37   :  { %1256 = vmatmul.msk.f32.gmra.mxu1 %vm78_vm0, %v61_v35 }
  0x38   :  { %432 = vmatpush.msra.mxu1 %v1845_v63 }
  0x39   :  { %1272 = vmatmul.msk.f32.gmra.mxu3 %vm78_vm0, %v61_v35 }
  0x3a   :  { %516 = vmatpush.msrb.mxu1 %v1606_v9 }
  0x3c   :  { %517 = vmatpush.msrb.mxu1 %v1616_v12 }
  0x3e   :  { %1265 = vmatmul.msk.f32.gmra.mxu2 %vm78_vm0, %v1584_v3  ;;  %518 = vmatpush.msrb.mxu1 %v1625_v15 }
  0x3f   :  { %1257 = vmatmul.msk.f32.gmra.mxu1 %vm78_vm0, %v1584_v3 }
  0x40   :  { %519 = vmatpush.msrb.mxu1 %v1639_v19 }
  0x41   :  { %1273 = vmatmul.msk.f32.gmra.mxu3 %vm78_vm0, %v1584_v3  ;;  %v1814_v3 = vld [vmem:[#allocation3 + $0x60] sm:$0xff] }
  0x42   :  { %2699 = vst [vmem:[#allocation29_spill] sm:$0xff] %v1814_v3  ;;  %409 = vmatpush.msrb.mxu0 %v1814_v3  ;;  %520 = vmatpush.msrb.mxu1 %v1649_v22 }
  0x44   :  { %410 = vmatpush.msrb.mxu0 %v1830_v30  ;;  %521 = vmatpush.msrb.mxu1 %v1663_v26 }
  0x46   :  { %1266 = vmatmul.msk.f32.gmra.mxu2 %vm78_vm0, %v1576_v1  ;;  %411 = vmatpush.msrb.mxu0 %v1843_v2 }
  0x47   :  { %1258 = vmatmul.msk.f32.gmra.mxu1 %vm78_vm0, %v1576_v1 }
  0x48   :  { %522 = vmatpush.msrb.mxu1 %v1671_v28 }
  0x49   :  { %1274 = vmatmul.msk.f32.gmra.mxu3 %vm78_vm0, %v1576_v1  ;;  %v1807_v1 = vld [vmem:[#allocation3 + $0x50] sm:$0xff] }
  0x4a   :  { %2697 = vst [vmem:[#allocation27_spill] sm:$0xff] %v1807_v1  ;;  %450 = vmatpush.msra.mxu2 %v1807_v1  ;;  %v1837_v1 = vperm.slane %v56_v60, 1  ;;  %523 = vmatpush.msrb.mxu1 %v1699_v34 }
  0x4c   :  { %451 = vmatpush.msra.mxu2 %v1826_v24  ;;  %2706 = vst [vmem:[#allocation36_spill] sm:$0xff] %v1837_v1  ;;  %524 = vmatpush.msrb.mxu1 %v1718_v40 }
  0x4e   :  { %1267 = vmatmul.msk.f32.gmra.mxu2 %vm78_vm0, %v1596_v5  ;;  %525 = vmatpush.msrb.mxu1 %v1747_v47 }
  0x4f   :  { %1259 = vmatmul.msk.f32.gmra.mxu1 %vm78_vm0, %v1596_v5 }
  0x50   :  { %526 = vmatpush.msrb.mxu1 %v1770_v53 }
  0x51   :  { %1275 = vmatmul.msk.f32.gmra.mxu3 %vm78_vm0, %v1596_v5  ;;  %v1841_v5 = vld [vmem:[#allocation3 + $0x10] sm:$0xff] }
  0x52   :  { %2707 = vst [vmem:[#allocation37_spill] sm:$0xff] %v1841_v5  ;;  %452 = vmatpush.msra.mxu2 %v1841_v5  ;;  %527 = vmatpush.msrb.mxu1 %v1782_v57 }
  0x54   :  { %536 = vmatpush.msrb.mxu2 %v1601_v7  ;;  %528 = vmatpush.msrb.mxu1 %v1797_v62 }
  0x56   :  { %537 = vmatpush.msrb.mxu2 %v1613_v11 }
  0x58   :  { %538 = vmatpush.msrb.mxu2 %v1623_v14 }
  0x5a   :  { %539 = vmatpush.msrb.mxu2 %v1635_v18 }
  0x5c   :  { %540 = vmatpush.msrb.mxu2 %v1644_v21 }
  0x5e   :  { %541 = vmatpush.msrb.mxu2 %v1658_v25 }
  0x60   :  { %542 = vmatpush.msrb.mxu2 %v1666_v27 }
  0x62   :  { %543 = vmatpush.msrb.mxu2 %v1693_v32 }
  0x64   :  { %544 = vmatpush.msrb.mxu2 %v1712_v38 }
  0x66   :  { %545 = vmatpush.msrb.mxu2 %v1745_v46 }
  0x68   :  { %546 = vmatpush.msrb.mxu2 %v1768_v52 }
  0x6a   :  { %547 = vmatpush.msrb.mxu2 %v1778_v55 }
  0x8b   :  { %v1803_v0 = vpop.f32.mrf.mxu1 }
  0x8c   :  { %2696 = vst [vmem:[#allocation26_spill] sm:$0xff] %v1803_v0  ;;  %v1835_v0 = vld [vmem:[#allocation3 + $0x38] sm:$0xff] }
  0x8d   :  { %2705 = vst [vmem:[#allocation35_spill] sm:$0xff] %v1835_v0  ;;  %471 = vmatpush.msra.mxu3 %v1835_v0 }
  0x8e   :  { %v120_v8 = vpop.f32.mrf.mxu0 }
  0x8f   :  { %v121_v35 = vadd.f32 %v120_v8, %v1816_v4  ;;  %v1851_v8 = vld [vmem:[#allocation3 + $0x18] sm:$0xff]  ;;  %v1855_v4 = vld [vmem:[#allocation3] sm:$0xff] }
  0x90   :  { %2711 = vst [vmem:[#allocation41_spill] sm:$0xff] %v1851_v8  ;;  %472 = vmatpush.msra.mxu3 %v1851_v8  ;;  %412 = vmatpush.msrb.mxu0 %v1855_v4 }
  0x91   :  { %v1847_v61 = vpop.f32.mrf.mxu2  ;;  %1289 = vtanh.f32 %v121_v35  ;;  %2712 = vst [vmem:[#allocation42_spill] sm:$0xff] %v1855_v4  ;;  %v1866_v35 = vperm.slane %v56_v60, 2 }
  0x92   :  { %2710 = vst [vmem:[#allocation40_spill] sm:$0xff] %v1847_v61  ;;  %556 = vmatpush.msrb.mxu3 %v1608_v10  ;;  %496 = vmatpush.msra.mxu0 %v1631_v17  ;;  %v322_v10 = vlaneseq }
  0x93   :  { %2714 = vst [vmem:[#allocation44_spill] sm:$0xff] %v1866_v35 }
  0x94   :  { %v161_v24 = vpop.f32.mrf.mxu1  ;;  %v1860_v29 = vpop.f32.mrf.mxu3  ;;  %557 = vmatpush.msrb.mxu3 %v1618_v13  ;;  %497 = vmatpush.msra.mxu0 %v1695_v33 }
  0x95   :  { %v162_v61 = vadd.f32 %v161_v24, %v1837_v1  ;;  %2713 = vst [vmem:[#allocation43_spill] sm:$0xff] %v1860_v29  ;;  %v1874_v1 = vperm.slane %v56_v60, 3 }
  0x96   :  { %558 = vmatpush.msrb.mxu3 %v1629_v16  ;;  %498 = vmatpush.msra.mxu0 %v1706_v36 }
  0x97   :  { %1291 = vtanh.f32 %v162_v61  ;;  %v1290_v24 = vpop.eup %1289  ;;  %2715 = vst [vmem:[#allocation45_spill] sm:$0xff] %v1874_v1 }
  0x98   :  { %v311_v13 = vmul.f32 0.5, %v1290_v24  ;;  %559 = vmatpush.msrb.mxu3 %v1641_v20  ;;  %499 = vmatpush.msra.mxu0 %v1716_v39 }
  0x99   :  { %v202_v29 = vpop.f32.mrf.mxu2 }
  0x9a   :  { %v203_v61 = vadd.f32 %v202_v29, %v1866_v35  ;;  %v323_v29 = vand.u32 127, %v322_v10  ;;  %560 = vmatpush.msrb.mxu3 %v1651_v23  ;;  %500 = vmatpush.msra.mxu0 %v1725_v41  ;;  %v312_v24 = vadd.f32 0.5, %v311_v13 }
  0x9c   :  { %1293 = vtanh.f32 %v203_v61  ;;  %v243_v60 = vpop.f32.mrf.mxu3  ;;  %561 = vmatpush.msrb.mxu3 %v1691_v31  ;;  %501 = vmatpush.msra.mxu0 %v1732_v42  ;;  %vm324_vm1 = vcmp.lt.s32.totalorder %v323_v29, 64 }
  0x9d   :  { %v1292_v15 = vpop.eup %1291  ;;  %v244_v16 = vadd.f32 %v243_v60, %v1874_v1  ;;  %v2722_v1 = vld [vmem:[#allocation32_spill] sm:$0xff] }
  0x9e   :  { %v313_v14 = vmul.f32 0.5, %v1292_v15  ;;  %562 = vmatpush.msrb.mxu3 %v1708_v37  ;;  %502 = vmatpush.msra.mxu0 %v1737_v43 }
  0x9f   :  { %1295 = vtanh.f32 %v244_v16 }
  0xa0   :  { %v314_v35 = vadd.f32 0.5, %v313_v14  ;;  %563 = vmatpush.msrb.mxu3 %v1740_v44  ;;  %v1527_v14 = vmov 0.0   ;;  %503 = vmatpush.msra.mxu0 %v1742_v45 }
  0xa1   :  { %v1276_v16 = vsel %vm324_vm1, 1.0, %v1527_v14 }
  0xa2   :  { %v317_v10 = vmul.f32 0.0, %v314_v35  ;;  %v1294_v15 = vpop.eup %1293  ;;  %564 = vmatpush.msrb.mxu3 %v1752_v48  ;;  %504 = vmatpush.msra.mxu0 %v1754_v49 }
  0xa3   :  { %v318_v13 = vmul.f32 %v1294_v15, %v312_v24  ;;  %v2717_v15 = vld [vmem:[#allocation23_spill] sm:$0xff] }
  0xa4   :  { %565 = vmatpush.msrb.mxu3 %v1758_v50  ;;  %505 = vmatpush.msra.mxu0 %v1764_v51 }
  0xa5   :  { %v1296_v35 = vpop.eup %1295  ;;  %v319_v61 = vadd.f32 %v318_v13, %v317_v10  ;;  %548 = vmatpush.msrb.mxu2 %v2717_v15  ;;  %v2718_v13 = vld [vmem:[#allocation25_spill] sm:$0xff] }
  0xa6   :  { %v315_v60 = vmul.f32 0.5, %v1296_v35  ;;  %566 = vmatpush.msrb.mxu3 %v1772_v54  ;;  %506 = vmatpush.msra.mxu0 %v1780_v56  ;;  %v2719_v35 = vld [vmem:[#allocation28_spill] sm:$0xff] }
  0xa7   :  { %1297 = vtanh.f32 %v319_v61  ;;  %v1906_v29 = vmul.f32 %v1276_v16, %v319_v61  ;;  %529 = vmatpush.msrb.mxu1 %v2719_v35  ;;  %v2720_v61 = vld [vmem:[#allocation27_spill] sm:$0xff] }
  0xa8   :  { %v316_v24 = vadd.f32 0.5, %v315_v60  ;;  %567 = vmatpush.msrb.mxu3 %v1786_v58  ;;  %507 = vmatpush.msra.mxu0 %v1788_v59 }
  0xa9   :  { %2716 = vst [vmem:[#allocation46_spill] sm:$0xff] %v1906_v29  ;;  %549 = vmatpush.msrb.mxu2 %v2720_v61  ;;  %v2721_v29 = vld [vmem:[#allocation33_spill] sm:$0xff] }
  0xaa   :  { %568 = vmatpush.msrb.mxu3 %v2718_v13  ;;  %508 = vmatpush.msra.mxu0 %v1814_v3 }
  0xab   :  { %530 = vmatpush.msrb.mxu1 %v2721_v29  ;;  %550 = vmatpush.msrb.mxu2 %v2722_v1 }
  0xac   :  { %569 = vmatpush.msrb.mxu3 %v1820_v6  ;;  %509 = vmatpush.msra.mxu0 %v1830_v30 }
  0xad   :  { %v1298_v10 = vpop.eup %1297  ;;  %531 = vmatpush.msrb.mxu1 %v1845_v63  ;;  %551 = vmatpush.msrb.mxu2 %v1841_v5 }
  0xae   :  { %v321_v14 = vmul.f32 %v1298_v10, %v316_v24  ;;  %570 = vmatpush.msrb.mxu3 %v1835_v0  ;;  %510 = vmatpush.msra.mxu0 %v1843_v2  ;;  %v2724_v24 = vld [vmem:[#allocation13_spill] sm:$0xff]  ;;  %v2725_v10 = vld [vmem:[#allocation15_spill] sm:$0xff] }
  0xb0   :  { %v327_v60 = vmul.f32 %v1276_v16, %v321_v14  ;;  %571 = vmatpush.msrb.mxu3 %v1851_v8  ;;  %511 = vmatpush.msra.mxu0 %v1855_v4  ;;  %v2723_v16 = vld [vmem:[#allocation12_spill] sm:$0xff]  ;;  %v2726_v14 = vld [vmem:[#allocation14_spill] sm:$0xff] }
  0xb2   :  { %413 = vmatmul.f32.vlgmr.msrb.gmra.mxu0 %v327_v60  ;;  %433 = vmatmul.f32.vlgmr.msra.gmra.mxu1 %v327_v60 }
  0xb3   :  { %453 = vmatmul.f32.vlgmr.msra.gmra.mxu2 %v327_v60  ;;  %473 = vmatmul.f32.vlgmr.msra.gmra.mxu3 %v327_v60  ;;  %v2727_v60 = vld [vmem:[#allocation16_spill] sm:$0xff] }
  0xb4   :  { %615 = vmatpush.msra.mxu1 %v1606_v9  ;;  %595 = vmatpush.msrb.mxu0 %v1631_v17 }
  0xb5   :  { %635 = vmatpush.msra.mxu2 %v1601_v7  ;;  %655 = vmatpush.msra.mxu3 %v2723_v16 }
  0xb6   :  { %616 = vmatpush.msra.mxu1 %v1616_v12  ;;  %596 = vmatpush.msrb.mxu0 %v1695_v33 }
  0xb7   :  { %636 = vmatpush.msra.mxu2 %v1613_v11  ;;  %656 = vmatpush.msra.mxu3 %v2724_v24 }
  0xb8   :  { %617 = vmatpush.msra.mxu1 %v2725_v10  ;;  %597 = vmatpush.msrb.mxu0 %v1706_v36 }
  0xb9   :  { %637 = vmatpush.msra.mxu2 %v2726_v14  ;;  %657 = vmatpush.msra.mxu3 %v2727_v60 }
  0xba   :  { %618 = vmatpush.msra.mxu1 %v1639_v19  ;;  %598 = vmatpush.msrb.mxu0 %v1716_v39 }
  0xbb   :  { %638 = vmatpush.msra.mxu2 %v1635_v18  ;;  %658 = vmatpush.msra.mxu3 %v1641_v20 }
  0xbc   :  { %619 = vmatpush.msra.mxu1 %v1649_v22  ;;  %599 = vmatpush.msrb.mxu0 %v1725_v41 }
  0xbd   :  { %639 = vmatpush.msra.mxu2 %v1644_v21  ;;  %659 = vmatpush.msra.mxu3 %v1651_v23 }
  0xbe   :  { %620 = vmatpush.msra.mxu1 %v1663_v26  ;;  %600 = vmatpush.msrb.mxu0 %v1732_v42 }
  0xbf   :  { %640 = vmatpush.msra.mxu2 %v1658_v25  ;;  %660 = vmatpush.msra.mxu3 %v1691_v31 }
  0xc0   :  { %621 = vmatpush.msra.mxu1 %v1671_v28  ;;  %601 = vmatpush.msrb.mxu0 %v1737_v43 }
  0xc1   :  { %641 = vmatpush.msra.mxu2 %v1666_v27  ;;  %661 = vmatpush.msra.mxu3 %v1708_v37 }
  0xc2   :  { %622 = vmatpush.msra.mxu1 %v1699_v34  ;;  %602 = vmatpush.msrb.mxu0 %v1742_v45 }
  0xc3   :  { %642 = vmatpush.msra.mxu2 %v1693_v32  ;;  %662 = vmatpush.msra.mxu3 %v1740_v44 }
  0xc4   :  { %623 = vmatpush.msra.mxu1 %v1718_v40  ;;  %603 = vmatpush.msrb.mxu0 %v1754_v49 }
  0xc5   :  { %643 = vmatpush.msra.mxu2 %v1712_v38  ;;  %663 = vmatpush.msra.mxu3 %v1752_v48 }
  0xc6   :  { %624 = vmatpush.msra.mxu1 %v1747_v47  ;;  %604 = vmatpush.msrb.mxu0 %v1764_v51 }
  0xc7   :  { %644 = vmatpush.msra.mxu2 %v1745_v46  ;;  %664 = vmatpush.msra.mxu3 %v1758_v50 }
  0xc8   :  { %625 = vmatpush.msra.mxu1 %v1770_v53  ;;  %605 = vmatpush.msrb.mxu0 %v1780_v56 }
  0xc9   :  { %645 = vmatpush.msra.mxu2 %v1768_v52  ;;  %665 = vmatpush.msra.mxu3 %v1772_v54 }
  0xca   :  { %626 = vmatpush.msra.mxu1 %v1782_v57  ;;  %606 = vmatpush.msrb.mxu0 %v1788_v59  ;;  %v2752_v57 = vld [vmem:[#allocation45_spill] sm:$0xff] }
  0xcb   :  { %646 = vmatpush.msra.mxu2 %v1778_v55  ;;  %666 = vmatpush.msra.mxu3 %v1786_v58 }
  0xcc   :  { %627 = vmatpush.msra.mxu1 %v1797_v62  ;;  %607 = vmatpush.msrb.mxu0 %v1814_v3  ;;  %v2750_v3 = vld [vmem:[#allocation30_spill] sm:$0xff] }
  0xcd   :  { %647 = vmatpush.msra.mxu2 %v2717_v15  ;;  %667 = vmatpush.msra.mxu3 %v2718_v13 }
  0xce   :  { %628 = vmatpush.msra.mxu1 %v2719_v35  ;;  %608 = vmatpush.msrb.mxu0 %v1830_v30  ;;  %v164_v35 = vpop.f32.mrf.mxu1  ;;  %v246_v30 = vpop.f32.mrf.mxu3 }
  0xcf   :  { %648 = vmatpush.msra.mxu2 %v2720_v61  ;;  %668 = vmatpush.msra.mxu3 %v1820_v6  ;;  %v205_v61 = vpop.f32.mrf.mxu2 }
  0xd0   :  { %629 = vmatpush.msra.mxu1 %v2721_v29  ;;  %609 = vmatpush.msrb.mxu0 %v1843_v2 }
  0xd1   :  { %649 = vmatpush.msra.mxu2 %v2722_v1  ;;  %669 = vmatpush.msra.mxu3 %v1835_v0 }
  0xd2   :  { %630 = vmatpush.msra.mxu1 %v1845_v63  ;;  %610 = vmatpush.msrb.mxu0 %v1855_v4  ;;  %v123_v4 = vpop.f32.mrf.mxu0 }
  0xd3   :  { %650 = vmatpush.msra.mxu2 %v1841_v5  ;;  %670 = vmatpush.msra.mxu3 %v1851_v8 }
  0xd6   :  { %v1999_v6 = vpop.f32.mrf.mxu1  ;;  %v2003_v2 = vpop.f32.mrf.mxu3 }
  0xd7   :  { %2728 = vst [vmem:[#allocation12_spill] sm:$0xff] %v1999_v6  ;;  %v2001_v29 = vpop.f32.mrf.mxu2 }
  0xd8   :  { %2729 = vst [vmem:[#allocation13_spill] sm:$0xff] %v2001_v29 }
  0xd9   :  { %2730 = vst [vmem:[#allocation15_spill] sm:$0xff] %v2003_v2 }
  0xda   :  { %v2017_v15 = vpop.f32.mrf.mxu0 }
  0xdb   :  { %2737 = vst [vmem:[#allocation51_spill] sm:$0xff] %v2017_v15 }
  0xde   :  { %v2005_v1 = vpop.f32.mrf.mxu1  ;;  %v2009_v63 = vpop.f32.mrf.mxu3 }
  0xdf   :  { %2731 = vst [vmem:[#allocation14_spill] sm:$0xff] %v2005_v1  ;;  %v2007_v0 = vpop.f32.mrf.mxu2 }
  0xe0   :  { %2732 = vst [vmem:[#allocation16_spill] sm:$0xff] %v2007_v0 }
  0xe1   :  { %2733 = vst [vmem:[#allocation47_spill] sm:$0xff] %v2009_v63 }
  0xe2   :  { %v2025_v1 = vpop.f32.mrf.mxu0 }
  0xe3   :  { %2741 = vst [vmem:[#allocation55_spill] sm:$0xff] %v2025_v1 }
  0xe6   :  { %v2011_v13 = vpop.f32.mrf.mxu1  ;;  %v2015_v8 = vpop.f32.mrf.mxu3 }
  0xe7   :  { %2734 = vst [vmem:[#allocation48_spill] sm:$0xff] %v2011_v13  ;;  %v2013_v5 = vpop.f32.mrf.mxu2 }
  0xe8   :  { %2735 = vst [vmem:[#allocation49_spill] sm:$0xff] %v2013_v5 }
  0xe9   :  { %2736 = vst [vmem:[#allocation50_spill] sm:$0xff] %v2015_v8 }
  0xea   :  { %v2033_v13 = vpop.f32.mrf.mxu0 }
  0xeb   :  { %2745 = vst [vmem:[#allocation59_spill] sm:$0xff] %v2033_v13  ;;  %v247_v13 = vadd.f32 %v246_v30, %v2752_v57 }
  0xee   :  { %v2019_v6 = vpop.f32.mrf.mxu1  ;;  %v2023_v2 = vpop.f32.mrf.mxu3 }
  0xef   :  { %2738 = vst [vmem:[#allocation52_spill] sm:$0xff] %v2019_v6  ;;  %v2021_v29 = vpop.f32.mrf.mxu2  ;;  %v2749_v6 = vld [vmem:[#allocation36_spill] sm:$0xff] }
  0xf0   :  { %2739 = vst [vmem:[#allocation53_spill] sm:$0xff] %v2021_v29  ;;  %v165_v29 = vadd.f32 %v164_v35, %v2749_v6 }
  0xf1   :  { %2740 = vst [vmem:[#allocation54_spill] sm:$0xff] %v2023_v2  ;;  %v124_v2 = vadd.f32 %v123_v4, %v2750_v3 }
  0xf6   :  { %v2027_v0 = vpop.f32.mrf.mxu1  ;;  %v2031_v62 = vpop.f32.mrf.mxu3 }
  0xf7   :  { %2742 = vst [vmem:[#allocation56_spill] sm:$0xff] %v2027_v0  ;;  %v2029_v63 = vpop.f32.mrf.mxu2 }
  0xf8   :  { %2743 = vst [vmem:[#allocation57_spill] sm:$0xff] %v2029_v63  ;;  %v2751_v63 = vld [vmem:[#allocation44_spill] sm:$0xff] }
  0xf9   :  { %2744 = vst [vmem:[#allocation58_spill] sm:$0xff] %v2031_v62  ;;  %v206_v62 = vadd.f32 %v205_v61, %v2751_v63  ;;  %v2761_v61 = vld [vmem:[#allocation24_spill] sm:$0xff] }
  0xfe   :  { %v2035_v5 = vpop.f32.mrf.mxu1  ;;  %v2039_v15 = vpop.f32.mrf.mxu3 }
  0xff   :  { %2746 = vst [vmem:[#allocation60_spill] sm:$0xff] %v2035_v5  ;;  %v2037_v8 = vpop.f32.mrf.mxu2 }
 0x100   :  { %2747 = vst [vmem:[#allocation61_spill] sm:$0xff] %v2037_v8 }
 0x101   :  { %2748 = vst [vmem:[#allocation62_spill] sm:$0xff] %v2039_v15 }
 0x12f   :  { %v414_v58 = vpop.f32.mrf.mxu0  ;;  %v434_v1 = vpop.f32.mrf.mxu1 }
 0x130   :  { %v415_v55 = vadd.f32 %v414_v58, %v124_v2  ;;  %v435_v0 = vadd.f32 %v434_v1, %v165_v29  ;;  %v2753_v1 = vld [vmem:[#allocation46_spill] sm:$0xff] }
 0x132   :  { %1299 = vtanh.f32 %v415_v55 }
 0x133   :  { %1301 = vtanh.f32 %v435_v0 }
 0x136   :  { %v454_v59 = vpop.f32.mrf.mxu2  ;;  %v474_v5 = vpop.f32.mrf.mxu3 }
 0x137   :  { %v455_v54 = vadd.f32 %v454_v59, %v206_v62  ;;  %v475_v52 = vadd.f32 %v474_v5, %v247_v13  ;;  %v2760_v13 = vld [vmem:[#allocation29_spill] sm:$0xff] }
 0x138   :  { %v1300_v8 = vpop.eup %1299 }
 0x139   :  { %v1302_v15 = vpop.eup %1301  ;;  %1303 = vtanh.f32 %v455_v54  ;;  %v481_v35 = vmul.f32 0.5, %v1300_v8  ;;  %v2755_v54 = vld [vmem:[#allocation18_spill] sm:$0xff]  ;;  %v2758_v8 = vld [vmem:[#allocation19_spill] sm:$0xff] }
 0x13a   :  { %v483_v6 = vmul.f32 0.5, %v1302_v15  ;;  %1305 = vtanh.f32 %v475_v52  ;;  %v2754_v52 = vld [vmem:[#allocation17_spill] sm:$0xff] }
 0x13b   :  { %v482_v3 = vadd.f32 0.5, %v481_v35  ;;  %v2759_v15 = vld [vmem:[#allocation21_spill] sm:$0xff]  ;;  %v2762_v35 = vld [vmem:[#allocation23_spill] sm:$0xff] }
 0x13c   :  { %v484_v4 = vadd.f32 0.5, %v483_v6  ;;  %v2757_v6 = vld [vmem:[#allocation20_spill] sm:$0xff] }
 0x13e   :  { %v487_v55 = vmul.f32 %v484_v4, %v2753_v1  ;;  %v2763_v4 = vld [vmem:[#allocation25_spill] sm:$0xff]  ;;  %v2765_v1 = vld [vmem:[#allocation28_spill] sm:$0xff] }
 0x13f   :  { %v1304_v58 = vpop.eup %1303 }
 0x140   :  { %v488_v0 = vmul.f32 %v1304_v58, %v482_v3  ;;  %v1306_v2 = vpop.eup %1305  ;;  %v2756_v3 = vld [vmem:[#allocation22_spill] sm:$0xff] }
 0x141   :  { %v485_v30 = vmul.f32 0.5, %v1306_v2  ;;  %v2764_v58 = vld [vmem:[#allocation34_spill] sm:$0xff] }
 0x142   :  { %v2046_v29 = vadd.f32 %v488_v0, %v487_v55  ;;  %v2766_v55 = vld [vmem:[#allocation27_spill] sm:$0xff]  ;;  %v2768_v2 = vld [vmem:[#allocation38_spill] sm:$0xff] }
 0x143   :  { %v486_v59 = vadd.f32 0.5, %v485_v30  ;;  %v2767_v0 = vld [vmem:[#allocation31_spill] sm:$0xff]  ;;  %v2769_v30 = vld [vmem:[#allocation33_spill] sm:$0xff] }
 0x144   :  { %1307 = vtanh.f32 %v2046_v29 }
 0x14a   :  { %v1308_v62 = vpop.eup %1307 }
 0x14b   :  { %v491_v5 = vmul.f32 %v1308_v62, %v486_v59  ;;  %v2770_v59 = vld [vmem:[#allocation32_spill] sm:$0xff]  ;;  %v2771_v62 = vld [vmem:[#allocation35_spill] sm:$0xff] }
 0x14d   :  { %512 = vmatmul.f32.vlgmr.msra.gmra.mxu0 %v491_v5  ;;  %532 = vmatmul.f32.vlgmr.msrb.gmra.mxu1 %v491_v5 }
 0x14e   :  { %552 = vmatmul.f32.vlgmr.msrb.gmra.mxu2 %v491_v5  ;;  %572 = vmatmul.f32.vlgmr.msrb.gmra.mxu3 %v491_v5  ;;  %v2772_v5 = vld [vmem:[#allocation42_spill] sm:$0xff] }
 0x14f   :  { %694 = vmatpush.msra.mxu0 %v1631_v17  ;;  %714 = vmatpush.msrb.mxu1 %v1606_v9 }
 0x150   :  { %734 = vmatpush.msrb.mxu2 %v1601_v7  ;;  %754 = vmatpush.msrb.mxu3 %v2723_v16 }
 0x151   :  { %695 = vmatpush.msra.mxu0 %v1695_v33  ;;  %715 = vmatpush.msrb.mxu1 %v1616_v12 }
 0x152   :  { %735 = vmatpush.msrb.mxu2 %v1613_v11  ;;  %755 = vmatpush.msrb.mxu3 %v2724_v24 }
 0x153   :  { %696 = vmatpush.msra.mxu0 %v1706_v36  ;;  %716 = vmatpush.msrb.mxu1 %v2725_v10 }
 0x154   :  { %736 = vmatpush.msrb.mxu2 %v2726_v14  ;;  %756 = vmatpush.msrb.mxu3 %v2727_v60 }
 0x155   :  { %697 = vmatpush.msra.mxu0 %v1716_v39  ;;  %717 = vmatpush.msrb.mxu1 %v1639_v19 }
 0x156   :  { %737 = vmatpush.msrb.mxu2 %v1635_v18  ;;  %757 = vmatpush.msrb.mxu3 %v1641_v20 }
 0x157   :  { %698 = vmatpush.msra.mxu0 %v1725_v41  ;;  %718 = vmatpush.msrb.mxu1 %v1649_v22 }
 0x158   :  { %738 = vmatpush.msrb.mxu2 %v1644_v21  ;;  %758 = vmatpush.msrb.mxu3 %v1651_v23 }
 0x159   :  { %699 = vmatpush.msra.mxu0 %v1732_v42  ;;  %719 = vmatpush.msrb.mxu1 %v1663_v26 }
 0x15a   :  { %739 = vmatpush.msrb.mxu2 %v1658_v25  ;;  %759 = vmatpush.msrb.mxu3 %v1691_v31 }
 0x15b   :  { %700 = vmatpush.msra.mxu0 %v1737_v43  ;;  %720 = vmatpush.msrb.mxu1 %v1671_v28 }
 0x15c   :  { %740 = vmatpush.msrb.mxu2 %v1666_v27  ;;  %760 = vmatpush.msrb.mxu3 %v1708_v37 }
 0x15d   :  { %701 = vmatpush.msra.mxu0 %v1742_v45  ;;  %721 = vmatpush.msrb.mxu1 %v1699_v34 }
 0x15e   :  { %741 = vmatpush.msrb.mxu2 %v1693_v32  ;;  %761 = vmatpush.msrb.mxu3 %v1740_v44 }
 0x15f   :  { %702 = vmatpush.msra.mxu0 %v1754_v49  ;;  %722 = vmatpush.msrb.mxu1 %v1718_v40 }
 0x160   :  { %742 = vmatpush.msrb.mxu2 %v1712_v38  ;;  %762 = vmatpush.msrb.mxu3 %v1752_v48 }
 0x161   :  { %703 = vmatpush.msra.mxu0 %v1764_v51  ;;  %723 = vmatpush.msrb.mxu1 %v1747_v47 }
 0x162   :  { %743 = vmatpush.msrb.mxu2 %v1745_v46  ;;  %763 = vmatpush.msrb.mxu3 %v1758_v50 }
 0x163   :  { %704 = vmatpush.msra.mxu0 %v1780_v56  ;;  %724 = vmatpush.msrb.mxu1 %v1770_v53 }
 0x164   :  { %744 = vmatpush.msrb.mxu2 %v2754_v52  ;;  %764 = vmatpush.msrb.mxu3 %v2755_v54 }
 0x165   :  { %705 = vmatpush.msra.mxu0 %v2756_v3  ;;  %725 = vmatpush.msrb.mxu1 %v2757_v6 }
 0x166   :  { %745 = vmatpush.msrb.mxu2 %v2758_v8  ;;  %765 = vmatpush.msrb.mxu3 %v2759_v15 }
 0x167   :  { %706 = vmatpush.msra.mxu0 %v2760_v13  ;;  %726 = vmatpush.msrb.mxu1 %v2761_v61  ;;  %v2779_v13 = vld [vmem:[#allocation51_spill] sm:$0xff] }
 0x168   :  { %746 = vmatpush.msrb.mxu2 %v2762_v35  ;;  %766 = vmatpush.msrb.mxu3 %v2763_v4  ;;  %v2773_v35 = vld [vmem:[#allocation39_spill] sm:$0xff]  ;;  %v2774_v4 = vld [vmem:[#allocation37_spill] sm:$0xff] }
 0x169   :  { %707 = vmatpush.msra.mxu0 %v2764_v58  ;;  %727 = vmatpush.msrb.mxu1 %v2765_v1  ;;  %v2775_v58 = vld [vmem:[#allocation41_spill] sm:$0xff]  ;;  %v2776_v1 = vld [vmem:[#allocation36_spill] sm:$0xff] }
 0x16a   :  { %747 = vmatpush.msrb.mxu2 %v2766_v55  ;;  %767 = vmatpush.msrb.mxu3 %v2767_v0  ;;  %v2777_v55 = vld [vmem:[#allocation12_spill] sm:$0xff]  ;;  %v2778_v0 = vld [vmem:[#allocation30_spill] sm:$0xff] }
 0x16b   :  { %708 = vmatpush.msra.mxu0 %v2768_v2  ;;  %728 = vmatpush.msrb.mxu1 %v2769_v30  ;;  %v168_v61 = vadd.f32 %v2777_v55, %v2776_v1  ;;  %v127_v2 = vadd.f32 %v2779_v13, %v2778_v0 }
 0x16c   :  { %748 = vmatpush.msrb.mxu2 %v2770_v59  ;;  %768 = vmatpush.msrb.mxu3 %v2771_v62 }
 0x16d   :  { %709 = vmatpush.msra.mxu0 %v2772_v5  ;;  %729 = vmatpush.msrb.mxu1 %v2773_v35  ;;  %v2780_v5 = vld [vmem:[#allocation13_spill] sm:$0xff]  ;;  %v2781_v35 = vld [vmem:[#allocation15_spill] sm:$0xff] }
 0x16e   :  { %749 = vmatpush.msrb.mxu2 %v2774_v4  ;;  %769 = vmatpush.msrb.mxu3 %v2775_v58  ;;  %v209_v62 = vadd.f32 %v2780_v5, %v2751_v63  ;;  %v250_v4 = vadd.f32 %v2781_v35, %v2752_v57 }
 0x1ca   :  { %v513_v15 = vpop.f32.mrf.mxu0  ;;  %v533_v30 = vpop.f32.mrf.mxu1 }
 0x1cb   :  { %v514_v8 = vadd.f32 %v513_v15, %v127_v2  ;;  %v534_v59 = vadd.f32 %v533_v30, %v168_v61 }
 0x1cd   :  { %1309 = vtanh.f32 %v514_v8 }
 0x1ce   :  { %1311 = vtanh.f32 %v534_v59 }
 0x1d1   :  { %v553_v6 = vpop.f32.mrf.mxu2  ;;  %v573_v58 = vpop.f32.mrf.mxu3 }
 0x1d2   :  { %v554_v3 = vadd.f32 %v553_v6, %v209_v62  ;;  %v574_v55 = vadd.f32 %v573_v58, %v250_v4 }
 0x1d3   :  { %v1310_v54 = vpop.eup %1309 }
 0x1d4   :  { %v1312_v1 = vpop.eup %1311  ;;  %1313 = vtanh.f32 %v554_v3  ;;  %v580_v13 = vmul.f32 0.5, %v1310_v54 }
 0x1d5   :  { %v582_v0 = vmul.f32 0.5, %v1312_v1  ;;  %1315 = vtanh.f32 %v574_v55 }
 0x1d6   :  { %v581_v15 = vadd.f32 0.5, %v580_v13 }
 0x1d7   :  { %v583_v52 = vadd.f32 0.5, %v582_v0 }
 0x1d9   :  { %v586_v61 = vmul.f32 %v583_v52, %v2046_v29 }
 0x1da   :  { %v1314_v8 = vpop.eup %1313 }
 0x1db   :  { %v587_v2 = vmul.f32 %v1314_v8, %v581_v15  ;;  %v1316_v30 = vpop.eup %1315 }
 0x1dc   :  { %v584_v35 = vmul.f32 0.5, %v1316_v30  ;;  %v2204_v30 = vld [vmem:[#allocation3 + $0x1e8] sm:$0xff] }
 0x1dd   :  { %v2122_v59 = vadd.f32 %v587_v2, %v586_v61  ;;  %v2201_v2 = vld [vmem:[#allocation3 + $0x1e0] sm:$0xff] }
 0x1de   :  { %v585_v6 = vadd.f32 0.5, %v584_v35  ;;  %v2210_v35 = vld [vmem:[#allocation3 + $0x1f8] sm:$0xff] }
 0x1df   :  { %1317 = vtanh.f32 %v2122_v59 }
 0x1e5   :  { %v1318_v62 = vpop.eup %1317 }
 0x1e6   :  { %v590_v4 = vmul.f32 %v1318_v62, %v585_v6  ;;  %v2213_v6 = vld [vmem:[#allocation3 + $0x1c0] sm:$0xff]  ;;  %v2216_v62 = vld [vmem:[#allocation3 + $0x1c8] sm:$0xff] }
 0x1e8   :  { %611 = vmatmul.f32.vlgmr.msrb.gmra.mxu0 %v590_v4  ;;  %631 = vmatmul.f32.vlgmr.msra.gmra.mxu1 %v590_v4 }
 0x1e9   :  { %651 = vmatmul.f32.vlgmr.msra.gmra.mxu2 %v590_v4  ;;  %671 = vmatmul.f32.vlgmr.msra.gmra.mxu3 %v590_v4  ;;  %v2219_v4 = vld [vmem:[#allocation3 + $0x1d0] sm:$0xff] }
 0x1ea   :  { %793 = vmatpush.msrb.mxu0 %v1631_v17  ;;  %813 = vmatpush.msra.mxu1 %v1606_v9  ;;  %v2783_v9 = vld [vmem:[#allocation18_spill] sm:$0xff]  ;;  %v2786_v17 = vld [vmem:[#allocation19_spill] sm:$0xff] }
 0x1eb   :  { %833 = vmatpush.msra.mxu2 %v1601_v7  ;;  %853 = vmatpush.msra.mxu3 %v2723_v16  ;;  %v2782_v7 = vld [vmem:[#allocation17_spill] sm:$0xff] }
 0x1ec   :  { %794 = vmatpush.msrb.mxu0 %v1695_v33  ;;  %814 = vmatpush.msra.mxu1 %v1616_v12  ;;  %v2785_v12 = vld [vmem:[#allocation20_spill] sm:$0xff]  ;;  %v2799_v33 = vld [vmem:[#allocation35_spill] sm:$0xff] }
 0x1ed   :  { %834 = vmatpush.msra.mxu2 %v1613_v11  ;;  %854 = vmatpush.msra.mxu3 %v2724_v24  ;;  %v2784_v11 = vld [vmem:[#allocation22_spill] sm:$0xff] }
 0x1ee   :  { %795 = vmatpush.msrb.mxu0 %v1706_v36  ;;  %815 = vmatpush.msra.mxu1 %v2725_v10  ;;  %v2801_v36 = vld [vmem:[#allocation39_spill] sm:$0xff] }
 0x1ef   :  { %835 = vmatpush.msra.mxu2 %v2726_v14  ;;  %855 = vmatpush.msra.mxu3 %v2727_v60 }
 0x1f0   :  { %796 = vmatpush.msrb.mxu0 %v1716_v39  ;;  %816 = vmatpush.msra.mxu1 %v1639_v19  ;;  %v2788_v19 = vld [vmem:[#allocation29_spill] sm:$0xff]  ;;  %v2804_v39 = vld [vmem:[#allocation36_spill] sm:$0xff] }
 0x1f1   :  { %836 = vmatpush.msra.mxu2 %v1635_v18  ;;  %856 = vmatpush.msra.mxu3 %v1641_v20  ;;  %v2787_v18 = vld [vmem:[#allocation21_spill] sm:$0xff]  ;;  %v2789_v20 = vld [vmem:[#allocation24_spill] sm:$0xff] }
 0x1f2   :  { %797 = vmatpush.msrb.mxu0 %v1725_v41  ;;  %817 = vmatpush.msra.mxu1 %v1649_v22  ;;  %v2791_v22 = vld [vmem:[#allocation25_spill] sm:$0xff] }
 0x1f3   :  { %837 = vmatpush.msra.mxu2 %v1644_v21  ;;  %857 = vmatpush.msra.mxu3 %v1651_v23  ;;  %v2790_v21 = vld [vmem:[#allocation23_spill] sm:$0xff]  ;;  %v2792_v23 = vld [vmem:[#allocation34_spill] sm:$0xff] }
 0x1f4   :  { %798 = vmatpush.msrb.mxu0 %v1732_v42  ;;  %818 = vmatpush.msra.mxu1 %v1663_v26  ;;  %v2794_v26 = vld [vmem:[#allocation27_spill] sm:$0xff]  ;;  %v2806_v42 = vld [vmem:[#allocation30_spill] sm:$0xff] }
 0x1f5   :  { %838 = vmatpush.msra.mxu2 %v1658_v25  ;;  %858 = vmatpush.msra.mxu3 %v1691_v31  ;;  %v2793_v25 = vld [vmem:[#allocation28_spill] sm:$0xff]  ;;  %v2797_v31 = vld [vmem:[#allocation33_spill] sm:$0xff] }
 0x1f6   :  { %799 = vmatpush.msrb.mxu0 %v1737_v43  ;;  %819 = vmatpush.msra.mxu1 %v1671_v28  ;;  %v2796_v28 = vld [vmem:[#allocation38_spill] sm:$0xff]  ;;  %v2807_v43 = vld [vmem:[#allocation55_spill] sm:$0xff] }
 0x1f7   :  { %839 = vmatpush.msra.mxu2 %v1666_v27  ;;  %859 = vmatpush.msra.mxu3 %v1708_v37  ;;  %v2795_v27 = vld [vmem:[#allocation31_spill] sm:$0xff]  ;;  %v2802_v37 = vld [vmem:[#allocation37_spill] sm:$0xff] }
 0x1f8   :  { %800 = vmatpush.msrb.mxu0 %v1742_v45  ;;  %820 = vmatpush.msra.mxu1 %v1699_v34  ;;  %v2800_v34 = vld [vmem:[#allocation42_spill] sm:$0xff] }
 0x1f9   :  { %840 = vmatpush.msra.mxu2 %v1693_v32  ;;  %860 = vmatpush.msra.mxu3 %v1740_v44  ;;  %v2798_v32 = vld [vmem:[#allocation32_spill] sm:$0xff]  ;;  %v130_v44 = vadd.f32 %v2807_v43, %v2806_v42  ;;  %v2261_v43 = vld [vmem:[#allocation3 + $0x140] sm:$0xff] }
 0x1fa   :  { %801 = vmatpush.msrb.mxu0 %v1754_v49  ;;  %821 = vmatpush.msra.mxu1 %v1718_v40  ;;  %v2805_v40 = vld [vmem:[#allocation14_spill] sm:$0xff]  ;;  %v2808_v49 = vld [vmem:[#allocation16_spill] sm:$0xff] }
 0x1fb   :  { %841 = vmatpush.msra.mxu2 %v1712_v38  ;;  %861 = vmatpush.msra.mxu3 %v1752_v48  ;;  %v2803_v38 = vld [vmem:[#allocation41_spill] sm:$0xff]  ;;  %v171_v41 = vadd.f32 %v2805_v40, %v2804_v39 }
 0x1fc   :  { %802 = vmatpush.msrb.mxu0 %v1764_v51  ;;  %822 = vmatpush.msra.mxu1 %v1747_v47  ;;  %v2809_v51 = vld [vmem:[#allocation47_spill] sm:$0xff]  ;;  %v2255_v40 = vld [vmem:[#allocation3 + $0x170] sm:$0xff] }
 0x1fd   :  { %842 = vmatpush.msra.mxu2 %v1745_v46  ;;  %862 = vmatpush.msra.mxu3 %v1758_v50  ;;  %v212_v50 = vadd.f32 %v2808_v49, %v2751_v63  ;;  %v2279_v49 = vld [vmem:[#allocation3 + $0x130] sm:$0xff] }
 0x1fe   :  { %803 = vmatpush.msrb.mxu0 %v1780_v56  ;;  %823 = vmatpush.msra.mxu1 %v1770_v53  ;;  %v253_v53 = vadd.f32 %v2809_v51, %v2752_v57  ;;  %v2285_v51 = vld [vmem:[#allocation3 + $0x100] sm:$0xff] }
 0x1ff   :  { %843 = vmatpush.msra.mxu2 %v2782_v7  ;;  %863 = vmatpush.msra.mxu3 %v2783_v9  ;;  %v2222_v7 = vld [vmem:[#allocation3 + $0x1d8] sm:$0xff]  ;;  %v2225_v9 = vld [vmem:[#allocation3 + $0x1a0] sm:$0xff] }
 0x200   :  { %804 = vmatpush.msrb.mxu0 %v2784_v11  ;;  %824 = vmatpush.msra.mxu1 %v2785_v12  ;;  %v2228_v11 = vld [vmem:[#allocation3 + $0x1a8] sm:$0xff]  ;;  %v2231_v12 = vld [vmem:[#allocation3 + $0x1b0] sm:$0xff] }
 0x201   :  { %844 = vmatpush.msra.mxu2 %v2786_v17  ;;  %864 = vmatpush.msra.mxu3 %v2787_v18  ;;  %v2234_v17 = vld [vmem:[#allocation3 + $0x1b8] sm:$0xff]  ;;  %v2237_v18 = vld [vmem:[#allocation3 + $0x180] sm:$0xff] }
 0x202   :  { %805 = vmatpush.msrb.mxu0 %v2788_v19  ;;  %825 = vmatpush.msra.mxu1 %v2789_v20  ;;  %v2240_v20 = vld [vmem:[#allocation3 + $0x188] sm:$0xff] }
 0x203   :  { %845 = vmatpush.msra.mxu2 %v2790_v21  ;;  %865 = vmatpush.msra.mxu3 %v2791_v22  ;;  %v2243_v21 = vld [vmem:[#allocation3 + $0x190] sm:$0xff]  ;;  %v2246_v22 = vld [vmem:[#allocation3 + $0x198] sm:$0xff] }
 0x204   :  { %806 = vmatpush.msrb.mxu0 %v2792_v23  ;;  %826 = vmatpush.msra.mxu1 %v2793_v25  ;;  %v2249_v25 = vld [vmem:[#allocation3 + $0x160] sm:$0xff] }
 0x205   :  { %846 = vmatpush.msra.mxu2 %v2794_v26  ;;  %866 = vmatpush.msra.mxu3 %v2795_v27  ;;  %v2252_v26 = vld [vmem:[#allocation3 + $0x168] sm:$0xff] }
 0x206   :  { %807 = vmatpush.msrb.mxu0 %v2796_v28  ;;  %827 = vmatpush.msra.mxu1 %v2797_v31 }
 0x207   :  { %847 = vmatpush.msra.mxu2 %v2798_v32  ;;  %867 = vmatpush.msra.mxu3 %v2799_v33 }
 0x208   :  { %808 = vmatpush.msrb.mxu0 %v2800_v34  ;;  %828 = vmatpush.msra.mxu1 %v2801_v36 }
 0x209   :  { %848 = vmatpush.msra.mxu2 %v2802_v37  ;;  %868 = vmatpush.msra.mxu3 %v2803_v38 }
 0x265   :  { %v612_v45 = vpop.f32.mrf.mxu0  ;;  %v632_v46 = vpop.f32.mrf.mxu1 }
 0x266   :  { %v613_v47 = vadd.f32 %v612_v45, %v130_v44  ;;  %v633_v48 = vadd.f32 %v632_v46, %v171_v41  ;;  %v2258_v41 = vld [vmem:[#allocation3 + $0x178] sm:$0xff]  ;;  %v2264_v44 = vld [vmem:[#allocation3 + $0x148] sm:$0xff]  ;;  %v2267_v45 = vld [vmem:[#allocation3 + $0x150] sm:$0xff] }
 0x267   :  { %v2270_v46 = vld [vmem:[#allocation3 + $0x158] sm:$0xff] }
 0x268   :  { %1319 = vtanh.f32 %v613_v47  ;;  %v2273_v47 = vld [vmem:[#allocation3 + $0x120] sm:$0xff] }
 0x269   :  { %1321 = vtanh.f32 %v633_v48  ;;  %v2276_v48 = vld [vmem:[#allocation3 + $0x128] sm:$0xff] }
 0x26c   :  { %v652_v56 = vpop.f32.mrf.mxu2  ;;  %v672_v16 = vpop.f32.mrf.mxu3 }
 0x26d   :  { %v653_v24 = vadd.f32 %v652_v56, %v212_v50  ;;  %v673_v14 = vadd.f32 %v672_v16, %v253_v53  ;;  %v2282_v50 = vld [vmem:[#allocation3 + $0x138] sm:$0xff]  ;;  %v2288_v53 = vld [vmem:[#allocation3 + $0x108] sm:$0xff]  ;;  %v2291_v56 = vld [vmem:[#allocation3 + $0x110] sm:$0xff] }
 0x26e   :  { %v1320_v10 = vpop.eup %1319  ;;  %v2294_v16 = vld [vmem:[#allocation3 + $0x118] sm:$0xff] }
 0x26f   :  { %v1322_v60 = vpop.eup %1321  ;;  %1323 = vtanh.f32 %v653_v24  ;;  %v679_v29 = vmul.f32 0.5, %v1320_v10  ;;  %v2297_v24 = vld [vmem:[#allocation3 + $0xe0] sm:$0xff]  ;;  %v2300_v10 = vld [vmem:[#allocation3 + $0xe8] sm:$0xff] }
 0x270   :  { %v681_v52 = vmul.f32 0.5, %v1322_v60  ;;  %1325 = vtanh.f32 %v673_v14  ;;  %v2303_v14 = vld [vmem:[#allocation3 + $0xf0] sm:$0xff]  ;;  %v2306_v60 = vld [vmem:[#allocation3 + $0xf8] sm:$0xff] }
 0x271   :  { %v680_v3 = vadd.f32 0.5, %v679_v29  ;;  %v2309_v29 = vld [vmem:[#allocation3 + $0xc0] sm:$0xff] }
 0x272   :  { %v682_v54 = vadd.f32 0.5, %v681_v52  ;;  %v2312_v52 = vld [vmem:[#allocation3 + $0xc8] sm:$0xff] }
 0x274   :  { %v685_v1 = vmul.f32 %v682_v54, %v2122_v59  ;;  %v2207_v59 = vld [vmem:[#allocation3 + $0x1f0] sm:$0xff] }
 0x275   :  { %v1324_v58 = vpop.eup %1323  ;;  %v2315_v54 = vld [vmem:[#allocation3 + $0xd0] sm:$0xff] }
 0x276   :  { %v686_v0 = vmul.f32 %v1324_v58, %v680_v3  ;;  %v1326_v5 = vpop.eup %1325  ;;  %v2318_v3 = vld [vmem:[#allocation3 + $0xd8] sm:$0xff]  ;;  %v2321_v58 = vld [vmem:[#allocation3 + $0xa0] sm:$0xff] }
 0x277   :  { %v683_v13 = vmul.f32 0.5, %v1326_v5  ;;  %v2330_v5 = vld [vmem:[#allocation3 + $0xb8] sm:$0xff] }
 0x278   :  { %v2198_v55 = vadd.f32 %v686_v0, %v685_v1  ;;  %v2324_v1 = vld [vmem:[#allocation3 + $0xa8] sm:$0xff]  ;;  %v2327_v0 = vld [vmem:[#allocation3 + $0xb0] sm:$0xff]  ;;  %2811 = vst [vmem:[#allocation45_spill] sm:$0xff] %v2330_v5 }
 0x279   :  { %v684_v15 = vadd.f32 0.5, %v683_v13  ;;  %2810 = vst [vmem:[#allocation44_spill] sm:$0xff] %v2327_v0  ;;  %v2333_v13 = vld [vmem:[#allocation3 + $0x80] sm:$0xff] }
 0x27a   :  { %1327 = vtanh.f32 %v2198_v55  ;;  %2812 = vst [vmem:[#allocation46_spill] sm:$0xff] %v2333_v13 }
 0x280   :  { %v1328_v8 = vpop.eup %1327 }
 0x281   :  { %v689_v61 = vmul.f32 %v1328_v8, %v684_v15  ;;  %v2336_v15 = vld [vmem:[#allocation3 + $0x88] sm:$0xff]  ;;  %v2339_v8 = vld [vmem:[#allocation3 + $0x90] sm:$0xff] }
 0x282   :  { %2813 = vst [vmem:[#allocation12_spill] sm:$0xff] %v2336_v15 }
 0x283   :  { %710 = vmatmul.f32.vlgmr.msra.gmra.mxu0 %v689_v61  ;;  %730 = vmatmul.f32.vlgmr.msrb.gmra.mxu1 %v689_v61  ;;  %2814 = vst [vmem:[#allocation51_spill] sm:$0xff] %v2339_v8 }
 0x284   :  { %750 = vmatmul.f32.vlgmr.msrb.gmra.mxu2 %v689_v61  ;;  %770 = vmatmul.f32.vlgmr.msrb.gmra.mxu3 %v689_v61  ;;  %v2342_v61 = vld [vmem:[#allocation3 + $0x98] sm:$0xff] }
 0x285   :  { %892 = vmatpush.msra.mxu0 %v2201_v2  ;;  %912 = vmatpush.msrb.mxu1 %v2204_v30  ;;  %2815 = vst [vmem:[#allocation13_spill] sm:$0xff] %v2342_v61 }
 0x286   :  { %932 = vmatpush.msrb.mxu2 %v2207_v59  ;;  %952 = vmatpush.msrb.mxu3 %v2210_v35 }
 0x287   :  { %893 = vmatpush.msra.mxu0 %v2213_v6  ;;  %913 = vmatpush.msrb.mxu1 %v2216_v62 }
 0x288   :  { %933 = vmatpush.msrb.mxu2 %v2219_v4  ;;  %953 = vmatpush.msrb.mxu3 %v2222_v7 }
 0x289   :  { %894 = vmatpush.msra.mxu0 %v2225_v9  ;;  %914 = vmatpush.msrb.mxu1 %v2228_v11 }
 0x28a   :  { %934 = vmatpush.msrb.mxu2 %v2231_v12  ;;  %954 = vmatpush.msrb.mxu3 %v2234_v17 }
 0x28b   :  { %895 = vmatpush.msra.mxu0 %v2237_v18  ;;  %915 = vmatpush.msrb.mxu1 %v2240_v20 }
 0x28c   :  { %935 = vmatpush.msrb.mxu2 %v2243_v21  ;;  %955 = vmatpush.msrb.mxu3 %v2246_v22 }
 0x28d   :  { %896 = vmatpush.msra.mxu0 %v2249_v25  ;;  %916 = vmatpush.msrb.mxu1 %v2252_v26 }
 0x28e   :  { %936 = vmatpush.msrb.mxu2 %v2255_v40  ;;  %956 = vmatpush.msrb.mxu3 %v2258_v41 }
 0x28f   :  { %897 = vmatpush.msra.mxu0 %v2261_v43  ;;  %917 = vmatpush.msrb.mxu1 %v2264_v44 }
 0x290   :  { %937 = vmatpush.msrb.mxu2 %v2267_v45  ;;  %957 = vmatpush.msrb.mxu3 %v2270_v46 }
 0x291   :  { %898 = vmatpush.msra.mxu0 %v2273_v47  ;;  %918 = vmatpush.msrb.mxu1 %v2276_v48 }
 0x292   :  { %938 = vmatpush.msrb.mxu2 %v2279_v49  ;;  %958 = vmatpush.msrb.mxu3 %v2282_v50 }
 0x293   :  { %899 = vmatpush.msra.mxu0 %v2285_v51  ;;  %919 = vmatpush.msrb.mxu1 %v2288_v53 }
 0x294   :  { %939 = vmatpush.msrb.mxu2 %v2291_v56  ;;  %959 = vmatpush.msrb.mxu3 %v2294_v16 }
 0x295   :  { %900 = vmatpush.msra.mxu0 %v2297_v24  ;;  %920 = vmatpush.msrb.mxu1 %v2300_v10 }
 0x296   :  { %940 = vmatpush.msrb.mxu2 %v2303_v14  ;;  %960 = vmatpush.msrb.mxu3 %v2306_v60 }
 0x297   :  { %901 = vmatpush.msra.mxu0 %v2309_v29  ;;  %921 = vmatpush.msrb.mxu1 %v2312_v52 }
 0x298   :  { %941 = vmatpush.msrb.mxu2 %v2315_v54  ;;  %961 = vmatpush.msrb.mxu3 %v2318_v3 }
 0x299   :  { %902 = vmatpush.msra.mxu0 %v2321_v58  ;;  %922 = vmatpush.msrb.mxu1 %v2324_v1 }
 0x29a   :  { %942 = vmatpush.msrb.mxu2 %v2327_v0  ;;  %962 = vmatpush.msrb.mxu3 %v2330_v5  ;;  %v2346_v0 = vld [vmem:[#allocation3 + $0x68] sm:$0xff]  ;;  %v2349_v5 = vld [vmem:[#allocation3 + $0x70] sm:$0xff] }
 0x29b   :  { %903 = vmatpush.msra.mxu0 %v2333_v13  ;;  %923 = vmatpush.msrb.mxu1 %v2336_v15  ;;  %2816 = vst [vmem:[#allocation15_spill] sm:$0xff] %v2346_v0  ;;  %v2352_v13 = vld [vmem:[#allocation3 + $0x78] sm:$0xff] }
 0x29c   :  { %943 = vmatpush.msrb.mxu2 %v2339_v8  ;;  %963 = vmatpush.msrb.mxu3 %v2342_v61  ;;  %2817 = vst [vmem:[#allocation17_spill] sm:$0xff] %v2349_v5  ;;  %v2356_v8 = vld [vmem:[#allocation3 + $0x48] sm:$0xff]  ;;  %v2359_v61 = vld [vmem:[#allocation3 + $0x50] sm:$0xff] }
 0x29d   :  { %904 = vmatpush.msra.mxu0 %v2788_v19  ;;  %924 = vmatpush.msrb.mxu1 %v2346_v0  ;;  %2818 = vst [vmem:[#allocation18_spill] sm:$0xff] %v2352_v13  ;;  %v2821_v19 = vld [vmem:[#allocation48_spill] sm:$0xff] }
 0x29e   :  { %944 = vmatpush.msrb.mxu2 %v2349_v5  ;;  %964 = vmatpush.msrb.mxu3 %v2352_v13  ;;  %2819 = vst [vmem:[#allocation22_spill] sm:$0xff] %v2356_v8 }
 0x29f   :  { %905 = vmatpush.msra.mxu0 %v2792_v23  ;;  %925 = vmatpush.msrb.mxu1 %v2356_v8  ;;  %2820 = vst [vmem:[#allocation20_spill] sm:$0xff] %v2359_v61  ;;  %v174_v23 = vadd.f32 %v2821_v19, %v2804_v39 }
 0x2a0   :  { %945 = vmatpush.msrb.mxu2 %v2359_v61  ;;  %965 = vmatpush.msrb.mxu3 %v2795_v27  ;;  %v2822_v27 = vld [vmem:[#allocation59_spill] sm:$0xff] }
 0x2a1   :  { %906 = vmatpush.msra.mxu0 %v2796_v28  ;;  %926 = vmatpush.msrb.mxu1 %v2797_v31  ;;  %v133_v28 = vadd.f32 %v2822_v27, %v2806_v42 }
 0x2a2   :  { %946 = vmatpush.msrb.mxu2 %v2798_v32  ;;  %966 = vmatpush.msrb.mxu3 %v2799_v33  ;;  %v2823_v33 = vld [vmem:[#allocation49_spill] sm:$0xff] }
 0x2a3   :  { %907 = vmatpush.msra.mxu0 %v2800_v34  ;;  %927 = vmatpush.msrb.mxu1 %v2801_v36  ;;  %v215_v34 = vadd.f32 %v2823_v33, %v2751_v63  ;;  %v2824_v36 = vld [vmem:[#allocation50_spill] sm:$0xff] }
 0x2a4   :  { %947 = vmatpush.msrb.mxu2 %v2802_v37  ;;  %967 = vmatpush.msrb.mxu3 %v2803_v38  ;;  %v256_v37 = vadd.f32 %v2824_v36, %v2752_v57 }
 0x300   :  { %v711_v61 = vpop.f32.mrf.mxu0  ;;  %v731_v31 = vpop.f32.mrf.mxu1 }
 0x301   :  { %v712_v8 = vadd.f32 %v711_v61, %v133_v28  ;;  %v732_v32 = vadd.f32 %v731_v31, %v174_v23 }
 0x303   :  { %1329 = vtanh.f32 %v712_v8 }
 0x304   :  { %1331 = vtanh.f32 %v732_v32 }
 0x307   :  { %v751_v13 = vpop.f32.mrf.mxu2  ;;  %v771_v38 = vpop.f32.mrf.mxu3 }
 0x308   :  { %v752_v5 = vadd.f32 %v751_v13, %v215_v34  ;;  %v772_v19 = vadd.f32 %v771_v38, %v256_v37  ;;  %v2431_v37 = vld [vmem:[#allocation3 + $0x60] sm:$0xff] }
 0x309   :  { %v1330_v0 = vpop.eup %1329  ;;  %2831 = vst [vmem:[#allocation19_spill] sm:$0xff] %v2431_v37  ;;  %v2832_v38 = vld [vmem:[#allocation15_spill] sm:$0xff] }
 0x30a   :  { %v1332_v39 = vpop.eup %1331  ;;  %1333 = vtanh.f32 %v752_v5  ;;  %v778_v27 = vmul.f32 0.5, %v1330_v0  ;;  %v2828_v0 = vld [vmem:[#allocation12_spill] sm:$0xff]  ;;  %v2829_v5 = vld [vmem:[#allocation51_spill] sm:$0xff] }
 0x30b   :  { %v780_v42 = vmul.f32 0.5, %v1332_v39  ;;  %1335 = vtanh.f32 %v772_v19  ;;  %v2825_v39 = vld [vmem:[#allocation44_spill] sm:$0xff]  ;;  %v2833_v19 = vld [vmem:[#allocation17_spill] sm:$0xff] }
 0x30c   :  { %v779_v61 = vadd.f32 0.5, %v778_v27  ;;  %v2834_v27 = vld [vmem:[#allocation18_spill] sm:$0xff] }
 0x30d   :  { %v781_v15 = vadd.f32 0.5, %v780_v42  ;;  %v2826_v42 = vld [vmem:[#allocation45_spill] sm:$0xff] }
 0x30f   :  { %v784_v23 = vmul.f32 %v781_v15, %v2198_v55  ;;  %v2827_v55 = vld [vmem:[#allocation46_spill] sm:$0xff]  ;;  %v2830_v15 = vld [vmem:[#allocation13_spill] sm:$0xff] }
 0x310   :  { %v1334_v8 = vpop.eup %1333 }
 0x311   :  { %v785_v28 = vmul.f32 %v1334_v8, %v779_v61  ;;  %v1336_v31 = vpop.eup %1335  ;;  %v2437_v61 = vld [vmem:[#allocation3 + $0x40] sm:$0xff]  ;;  %v2836_v8 = vld [vmem:[#allocation22_spill] sm:$0xff] }
 0x312   :  { %v782_v33 = vmul.f32 0.5, %v1336_v31  ;;  %2835 = vst [vmem:[#allocation21_spill] sm:$0xff] %v2437_v61  ;;  %v2445_v31 = vld [vmem:[#allocation3 + $0x20] sm:$0xff] }
 0x313   :  { %v2380_v32 = vadd.f32 %v785_v28, %v784_v23  ;;  %v2837_v23 = vld [vmem:[#allocation20_spill] sm:$0xff]  ;;  %v2442_v28 = vld [vmem:[#allocation3 + $0x58] sm:$0xff]  ;;  %2839 = vst [vmem:[#allocation24_spill] sm:$0xff] %v2445_v31 }
 0x314   :  { %v783_v13 = vadd.f32 0.5, %v782_v33  ;;  %2838 = vst [vmem:[#allocation29_spill] sm:$0xff] %v2442_v28  ;;  %v2448_v33 = vld [vmem:[#allocation3 + $0x28] sm:$0xff] }
 0x315   :  { %1337 = vtanh.f32 %v2380_v32  ;;  %2840 = vst [vmem:[#allocation23_spill] sm:$0xff] %v2448_v33 }
 0x31b   :  { %v1338_v34 = vpop.eup %1337 }
 0x31c   :  { %v788_v36 = vmul.f32 %v1338_v34, %v783_v13  ;;  %v2451_v13 = vld [vmem:[#allocation3 + $0x30] sm:$0xff]  ;;  %v2454_v34 = vld [vmem:[#allocation3 + $0x38] sm:$0xff] }
 0x31d   :  { %2841 = vst [vmem:[#allocation25_spill] sm:$0xff] %v2451_v13 }
 0x31e   :  { %809 = vmatmul.f32.vlgmr.msrb.gmra.mxu0 %v788_v36  ;;  %829 = vmatmul.f32.vlgmr.msra.gmra.mxu1 %v788_v36  ;;  %2842 = vst [vmem:[#allocation34_spill] sm:$0xff] %v2454_v34 }
 0x31f   :  { %849 = vmatmul.f32.vlgmr.msra.gmra.mxu2 %v788_v36  ;;  %869 = vmatmul.f32.vlgmr.msra.gmra.mxu3 %v788_v36  ;;  %v2457_v36 = vld [vmem:[#allocation3] sm:$0xff] }
 0x320   :  { %991 = vmatpush.msrb.mxu0 %v2201_v2  ;;  %1011 = vmatpush.msra.mxu1 %v2204_v30  ;;  %2843 = vst [vmem:[#allocation28_spill] sm:$0xff] %v2457_v36 }
 0x321   :  { %1031 = vmatpush.msra.mxu2 %v2207_v59  ;;  %1051 = vmatpush.msra.mxu3 %v2210_v35 }
 0x322   :  { %992 = vmatpush.msrb.mxu0 %v2213_v6  ;;  %1012 = vmatpush.msra.mxu1 %v2216_v62 }
 0x323   :  { %1032 = vmatpush.msra.mxu2 %v2219_v4  ;;  %1052 = vmatpush.msra.mxu3 %v2222_v7 }
 0x324   :  { %993 = vmatpush.msrb.mxu0 %v2225_v9  ;;  %1013 = vmatpush.msra.mxu1 %v2228_v11 }
 0x325   :  { %1033 = vmatpush.msra.mxu2 %v2231_v12  ;;  %1053 = vmatpush.msra.mxu3 %v2234_v17 }
 0x326   :  { %994 = vmatpush.msrb.mxu0 %v2237_v18  ;;  %1014 = vmatpush.msra.mxu1 %v2240_v20 }
 0x327   :  { %1034 = vmatpush.msra.mxu2 %v2243_v21  ;;  %1054 = vmatpush.msra.mxu3 %v2246_v22 }
 0x328   :  { %995 = vmatpush.msrb.mxu0 %v2249_v25  ;;  %1015 = vmatpush.msra.mxu1 %v2252_v26 }
 0x329   :  { %1035 = vmatpush.msra.mxu2 %v2255_v40  ;;  %1055 = vmatpush.msra.mxu3 %v2258_v41 }
 0x32a   :  { %996 = vmatpush.msrb.mxu0 %v2261_v43  ;;  %1016 = vmatpush.msra.mxu1 %v2264_v44 }
 0x32b   :  { %1036 = vmatpush.msra.mxu2 %v2267_v45  ;;  %1056 = vmatpush.msra.mxu3 %v2270_v46 }
 0x32c   :  { %997 = vmatpush.msrb.mxu0 %v2273_v47  ;;  %1017 = vmatpush.msra.mxu1 %v2276_v48 }
 0x32d   :  { %1037 = vmatpush.msra.mxu2 %v2279_v49  ;;  %1057 = vmatpush.msra.mxu3 %v2282_v50 }
 0x32e   :  { %998 = vmatpush.msrb.mxu0 %v2285_v51  ;;  %1018 = vmatpush.msra.mxu1 %v2288_v53 }
 0x32f   :  { %1038 = vmatpush.msra.mxu2 %v2291_v56  ;;  %1058 = vmatpush.msra.mxu3 %v2294_v16 }
 0x330   :  { %999 = vmatpush.msrb.mxu0 %v2297_v24  ;;  %1019 = vmatpush.msra.mxu1 %v2300_v10 }
 0x331   :  { %1039 = vmatpush.msra.mxu2 %v2303_v14  ;;  %1059 = vmatpush.msra.mxu3 %v2306_v60 }
 0x332   :  { %1000 = vmatpush.msrb.mxu0 %v2309_v29  ;;  %1020 = vmatpush.msra.mxu1 %v2312_v52 }
 0x333   :  { %1040 = vmatpush.msra.mxu2 %v2315_v54  ;;  %1060 = vmatpush.msra.mxu3 %v2318_v3 }
 0x334   :  { %1001 = vmatpush.msrb.mxu0 %v2321_v58  ;;  %1021 = vmatpush.msra.mxu1 %v2324_v1 }
 0x335   :  { %1041 = vmatpush.msra.mxu2 %v2825_v39  ;;  %1061 = vmatpush.msra.mxu3 %v2826_v42 }
 0x336   :  { %1002 = vmatpush.msrb.mxu0 %v2827_v55  ;;  %1022 = vmatpush.msra.mxu1 %v2828_v0 }
 0x337   :  { %1042 = vmatpush.msra.mxu2 %v2829_v5  ;;  %1062 = vmatpush.msra.mxu3 %v2830_v15 }
 0x338   :  { %1003 = vmatpush.msrb.mxu0 %v2431_v37  ;;  %1023 = vmatpush.msra.mxu1 %v2832_v38 }
 0x339   :  { %1043 = vmatpush.msra.mxu2 %v2833_v19  ;;  %1063 = vmatpush.msra.mxu3 %v2834_v27 }
 0x33a   :  { %1004 = vmatpush.msrb.mxu0 %v2437_v61  ;;  %1024 = vmatpush.msra.mxu1 %v2836_v8  ;;  %v2850_v61 = vld [vmem:[#allocation52_spill] sm:$0xff] }
 0x33b   :  { %1044 = vmatpush.msra.mxu2 %v2837_v23  ;;  %1064 = vmatpush.msra.mxu3 %v2442_v28  ;;  %v2460_v28 = vld [vmem:[#allocation3 + $0x8] sm:$0xff]  ;;  %v2848_v23 = vld [vmem:[#allocation26_spill] sm:$0xff] }
 0x33c   :  { %1005 = vmatpush.msrb.mxu0 %v2445_v31  ;;  %1025 = vmatpush.msra.mxu1 %v2448_v33  ;;  %2844 = vst [vmem:[#allocation27_spill] sm:$0xff] %v2460_v28  ;;  %v2463_v31 = vld [vmem:[#allocation3 + $0x10] sm:$0xff]  ;;  %v2466_v33 = vld [vmem:[#allocation3 + $0x18] sm:$0xff] }
 0x33d   :  { %1045 = vmatpush.msra.mxu2 %v2451_v13  ;;  %1065 = vmatpush.msra.mxu3 %v2454_v34  ;;  %2845 = vst [vmem:[#allocation31_spill] sm:$0xff] %v2463_v31  ;;  %v2847_v13 = vld [vmem:[#allocation30_spill] sm:$0xff]  ;;  %v2849_v34 = vld [vmem:[#allocation36_spill] sm:$0xff] }
 0x33e   :  { %1006 = vmatpush.msrb.mxu0 %v2457_v36  ;;  %1026 = vmatpush.msra.mxu1 %v2460_v28  ;;  %2846 = vst [vmem:[#allocation38_spill] sm:$0xff] %v2466_v33  ;;  %v136_v8 = vadd.f32 %v2848_v23, %v2847_v13  ;;  %v177_v27 = vadd.f32 %v2850_v61, %v2849_v34  ;;  %v2851_v28 = vld [vmem:[#allocation53_spill] sm:$0xff] }
 0x33f   :  { %1046 = vmatpush.msra.mxu2 %v2463_v31  ;;  %1066 = vmatpush.msra.mxu3 %v2466_v33  ;;  %v218_v15 = vadd.f32 %v2851_v28, %v2751_v63  ;;  %v2852_v31 = vld [vmem:[#allocation54_spill] sm:$0xff] }
 0x340   :  { %v259_v5 = vadd.f32 %v2852_v31, %v2752_v57 }
 0x39b   :  { %v810_v19 = vpop.f32.mrf.mxu0  ;;  %v830_v36 = vpop.f32.mrf.mxu1 }
 0x39c   :  { %v811_v38 = vadd.f32 %v810_v19, %v136_v8  ;;  %v831_v37 = vadd.f32 %v830_v36, %v177_v27 }
 0x39e   :  { %1339 = vtanh.f32 %v811_v38 }
 0x39f   :  { %1341 = vtanh.f32 %v831_v37 }
 0x3a2   :  { %v850_v0 = vpop.f32.mrf.mxu2  ;;  %v870_v33 = vpop.f32.mrf.mxu3 }
 0x3a3   :  { %v851_v55 = vadd.f32 %v850_v0, %v218_v15  ;;  %v871_v23 = vadd.f32 %v870_v33, %v259_v5 }
 0x3a4   :  { %v1340_v42 = vpop.eup %1339 }
 0x3a5   :  { %v1342_v13 = vpop.eup %1341  ;;  %1343 = vtanh.f32 %v851_v55  ;;  %v877_v61 = vmul.f32 0.5, %v1340_v42 }
 0x3a6   :  { %v879_v34 = vmul.f32 0.5, %v1342_v13  ;;  %1345 = vtanh.f32 %v871_v23 }
 0x3a7   :  { %v878_v19 = vadd.f32 0.5, %v877_v61 }
 0x3a8   :  { %v880_v39 = vadd.f32 0.5, %v879_v34 }
 0x3aa   :  { %v883_v37 = vmul.f32 %v880_v39, %v2380_v32 }
 0x3ab   :  { %v1344_v38 = vpop.eup %1343 }
 0x3ac   :  { %v884_v27 = vmul.f32 %v1344_v38, %v878_v19  ;;  %v1346_v8 = vpop.eup %1345 }
 0x3ad   :  { %v881_v31 = vmul.f32 0.5, %v1346_v8 }
 0x3ae   :  { %v2478_v28 = vadd.f32 %v884_v27, %v883_v37  ;;  %v2881_v27 = vld [vmem:[#allocation43_spill] sm:$0xff] }
 0x3af   :  { %v882_v0 = vadd.f32 0.5, %v881_v31  ;;  %v2882_v31 = vld [vmem:[#allocation60_spill] sm:$0xff] }
 0x3b0   :  { %1347 = vtanh.f32 %v2478_v28 }
 0x3b6   :  { %v1348_v15 = vpop.eup %1347 }
 0x3b7   :  { %v887_v5 = vmul.f32 %v1348_v15, %v882_v0  ;;  %v1200_v15 = vld [vmem:[#allocation6 + $0x78] sm:$0xff] }
 0x3b9   :  { %908 = vmatmul.f32.vlgmr.msra.gmra.mxu0 %v887_v5  ;;  %928 = vmatmul.f32.vlgmr.msrb.gmra.mxu1 %v887_v5 }
 0x3ba   :  { %948 = vmatmul.f32.vlgmr.msrb.gmra.mxu2 %v887_v5  ;;  %968 = vmatmul.f32.vlgmr.msrb.gmra.mxu3 %v887_v5 }
 0x3bb   :  { %1090 = vmatpush.msra.mxu0 %v2201_v2  ;;  %1110 = vmatpush.msrb.mxu1 %v2204_v30  ;;  %v2853_v2 = vld [vmem:[#allocation44_spill] sm:$0xff]  ;;  %v2854_v30 = vld [vmem:[#allocation45_spill] sm:$0xff] }
 0x3bc   :  { %1130 = vmatpush.msrb.mxu2 %v2207_v59  ;;  %1150 = vmatpush.msrb.mxu3 %v2210_v35  ;;  %v2855_v59 = vld [vmem:[#allocation46_spill] sm:$0xff]  ;;  %v2856_v35 = vld [vmem:[#allocation12_spill] sm:$0xff] }
 0x3bd   :  { %1091 = vmatpush.msra.mxu0 %v2213_v6  ;;  %1111 = vmatpush.msrb.mxu1 %v2216_v62  ;;  %v2857_v6 = vld [vmem:[#allocation51_spill] sm:$0xff]  ;;  %v2858_v62 = vld [vmem:[#allocation13_spill] sm:$0xff] }
 0x3be   :  { %1131 = vmatpush.msrb.mxu2 %v2219_v4  ;;  %1151 = vmatpush.msrb.mxu3 %v2222_v7  ;;  %v2859_v4 = vld [vmem:[#allocation19_spill] sm:$0xff] }
 0x3bf   :  { %1092 = vmatpush.msra.mxu0 %v2225_v9  ;;  %1112 = vmatpush.msrb.mxu1 %v2228_v11  ;;  %v2860_v7 = vld [vmem:[#allocation15_spill] sm:$0xff]  ;;  %v2861_v9 = vld [vmem:[#allocation17_spill] sm:$0xff]  ;;  %v2862_v11 = vld [vmem:[#allocation18_spill] sm:$0xff] }
 0x3c0   :  { %1132 = vmatpush.msrb.mxu2 %v2231_v12  ;;  %1152 = vmatpush.msrb.mxu3 %v2234_v17  ;;  %v2863_v12 = vld [vmem:[#allocation21_spill] sm:$0xff]  ;;  %v2864_v17 = vld [vmem:[#allocation22_spill] sm:$0xff] }
 0x3c1   :  { %1093 = vmatpush.msra.mxu0 %v2237_v18  ;;  %1113 = vmatpush.msrb.mxu1 %v2240_v20  ;;  %v2865_v18 = vld [vmem:[#allocation20_spill] sm:$0xff]  ;;  %v2866_v20 = vld [vmem:[#allocation29_spill] sm:$0xff] }
 0x3c2   :  { %1133 = vmatpush.msrb.mxu2 %v2243_v21  ;;  %1153 = vmatpush.msrb.mxu3 %v2246_v22  ;;  %v2867_v21 = vld [vmem:[#allocation24_spill] sm:$0xff]  ;;  %v2868_v22 = vld [vmem:[#allocation23_spill] sm:$0xff] }
 0x3c3   :  { %1094 = vmatpush.msra.mxu0 %v2249_v25  ;;  %1114 = vmatpush.msrb.mxu1 %v2252_v26  ;;  %v2869_v25 = vld [vmem:[#allocation25_spill] sm:$0xff]  ;;  %v2870_v26 = vld [vmem:[#allocation34_spill] sm:$0xff] }
 0x3c4   :  { %1134 = vmatpush.msrb.mxu2 %v2255_v40  ;;  %1154 = vmatpush.msrb.mxu3 %v2258_v41  ;;  %v2871_v40 = vld [vmem:[#allocation28_spill] sm:$0xff]  ;;  %v2872_v41 = vld [vmem:[#allocation27_spill] sm:$0xff] }
 0x3c5   :  { %1095 = vmatpush.msra.mxu0 %v2261_v43  ;;  %1115 = vmatpush.msrb.mxu1 %v2264_v44  ;;  %v2873_v43 = vld [vmem:[#allocation31_spill] sm:$0xff]  ;;  %v2874_v44 = vld [vmem:[#allocation38_spill] sm:$0xff] }
 0x3c6   :  { %1135 = vmatpush.msrb.mxu2 %v2267_v45  ;;  %1155 = vmatpush.msrb.mxu3 %v2270_v46  ;;  %v2875_v45 = vld [vmem:[#allocation30_spill] sm:$0xff]  ;;  %v2876_v46 = vld [vmem:[#allocation40_spill] sm:$0xff] }
 0x3c7   :  { %1096 = vmatpush.msra.mxu0 %v2273_v47  ;;  %1116 = vmatpush.msrb.mxu1 %v2276_v48  ;;  %v139_v47 = vadd.f32 %v2876_v46, %v2875_v45  ;;  %v2877_v48 = vld [vmem:[#allocation36_spill] sm:$0xff]  ;;  %v142_v8 = vadd.f32 %v2881_v27, %v2875_v45 }
 0x3c8   :  { %1136 = vmatpush.msrb.mxu2 %v2279_v49  ;;  %1156 = vmatpush.msrb.mxu3 %v2282_v50  ;;  %v2878_v49 = vld [vmem:[#allocation56_spill] sm:$0xff]  ;;  %v183_v0 = vadd.f32 %v2882_v31, %v2877_v48 }
 0x3c9   :  { %1097 = vmatpush.msra.mxu0 %v2285_v51  ;;  %1117 = vmatpush.msrb.mxu1 %v2288_v53  ;;  %v180_v50 = vadd.f32 %v2878_v49, %v2877_v48 }
 0x3ca   :  { %1137 = vmatpush.msrb.mxu2 %v2291_v56  ;;  %1157 = vmatpush.msrb.mxu3 %v2294_v16 }
 0x3cb   :  { %1098 = vmatpush.msra.mxu0 %v2297_v24  ;;  %1118 = vmatpush.msrb.mxu1 %v2300_v10  ;;  %v2879_v24 = vld [vmem:[#allocation57_spill] sm:$0xff] }
 0x3cc   :  { %1138 = vmatpush.msrb.mxu2 %v2303_v14  ;;  %1158 = vmatpush.msrb.mxu3 %v2306_v60  ;;  %v221_v10 = vadd.f32 %v2879_v24, %v2751_v63  ;;  %v2880_v14 = vld [vmem:[#allocation58_spill] sm:$0xff]  ;;  %v1194_v24 = vld [vmem:[#allocation6 + $0x48] sm:$0xff] }
 0x3cd   :  { %1099 = vmatpush.msra.mxu0 %v2309_v29  ;;  %1119 = vmatpush.msrb.mxu1 %v2312_v52  ;;  %v262_v60 = vadd.f32 %v2880_v14, %v2752_v57  ;;  %v1192_v14 = vld [vmem:[#allocation6 + $0x38] sm:$0xff] }
 0x3ce   :  { %1139 = vmatpush.msrb.mxu2 %v2315_v54  ;;  %1159 = vmatpush.msrb.mxu3 %v2318_v3 }
 0x3cf   :  { %1100 = vmatpush.msra.mxu0 %v2321_v58  ;;  %1120 = vmatpush.msrb.mxu1 %v2324_v1 }
 0x3d0   :  { %1140 = vmatpush.msrb.mxu2 %v2853_v2  ;;  %1160 = vmatpush.msrb.mxu3 %v2854_v30 }
 0x3d1   :  { %1101 = vmatpush.msra.mxu0 %v2855_v59  ;;  %1121 = vmatpush.msrb.mxu1 %v2856_v35  ;;  %v2883_v59 = vld [vmem:[#allocation61_spill] sm:$0xff] }
 0x3d2   :  { %1141 = vmatpush.msrb.mxu2 %v2857_v6  ;;  %1161 = vmatpush.msrb.mxu3 %v2858_v62  ;;  %v224_v35 = vadd.f32 %v2883_v59, %v2751_v63  ;;  %v2884_v6 = vld [vmem:[#allocation62_spill] sm:$0xff] }
 0x3d3   :  { %1102 = vmatpush.msra.mxu0 %v2859_v4  ;;  %1122 = vmatpush.msrb.mxu1 %v2860_v7  ;;  %v265_v62 = vadd.f32 %v2884_v6, %v2752_v57 }
 0x3d4   :  { %1142 = vmatpush.msrb.mxu2 %v2861_v9  ;;  %1162 = vmatpush.msrb.mxu3 %v2862_v11 }
 0x3d5   :  { %1103 = vmatpush.msra.mxu0 %v2863_v12  ;;  %1123 = vmatpush.msrb.mxu1 %v2864_v17 }
 0x3d6   :  { %1143 = vmatpush.msrb.mxu2 %v2865_v18  ;;  %1163 = vmatpush.msrb.mxu3 %v2866_v20 }
 0x3d7   :  { %1104 = vmatpush.msra.mxu0 %v2867_v21  ;;  %1124 = vmatpush.msrb.mxu1 %v2868_v22 }
 0x3d8   :  { %1144 = vmatpush.msrb.mxu2 %v2869_v25  ;;  %1164 = vmatpush.msrb.mxu3 %v2870_v26 }
 0x3d9   :  { %1105 = vmatpush.msra.mxu0 %v2871_v40  ;;  %1125 = vmatpush.msrb.mxu1 %v2872_v41 }
 0x3da   :  { %1145 = vmatpush.msrb.mxu2 %v2873_v43  ;;  %1165 = vmatpush.msrb.mxu3 %v2874_v44 }
 0x436   :  { %v909_v51 = vpop.f32.mrf.mxu0  ;;  %v929_v53 = vpop.f32.mrf.mxu1 }
 0x437   :  { %v910_v56 = vadd.f32 %v909_v51, %v139_v47  ;;  %v930_v16 = vadd.f32 %v929_v53, %v180_v50  ;;  %v1199_v50 = vld [vmem:[#allocation6 + $0x70] sm:$0xff]  ;;  %v1198_v51 = vld [vmem:[#allocation6 + $0x68] sm:$0xff]  ;;  %v1197_v53 = vld [vmem:[#allocation6 + $0x60] sm:$0xff] }
 0x439   :  { %1349 = vtanh.f32 %v910_v56  ;;  %v1196_v56 = vld [vmem:[#allocation6 + $0x58] sm:$0xff] }
 0x43a   :  { %1351 = vtanh.f32 %v930_v16  ;;  %v1195_v16 = vld [vmem:[#allocation6 + $0x50] sm:$0xff] }
 0x43d   :  { %v949_v29 = vpop.f32.mrf.mxu2  ;;  %v969_v52 = vpop.f32.mrf.mxu3 }
 0x43e   :  { %v950_v54 = vadd.f32 %v949_v29, %v221_v10  ;;  %v970_v58 = vadd.f32 %v969_v52, %v262_v60  ;;  %v1193_v10 = vld [vmem:[#allocation6 + $0x40] sm:$0xff]  ;;  %v1191_v60 = vld [vmem:[#allocation6 + $0x30] sm:$0xff]  ;;  %v1190_v29 = vld [vmem:[#allocation6 + $0x28] sm:$0xff] }
 0x43f   :  { %v1350_v3 = vpop.eup %1349  ;;  %v1189_v52 = vld [vmem:[#allocation6 + $0x20] sm:$0xff] }
 0x440   :  { %v1352_v1 = vpop.eup %1351  ;;  %1353 = vtanh.f32 %v950_v54  ;;  %v976_v32 = vmul.f32 0.5, %v1350_v3  ;;  %v1188_v54 = vld [vmem:[#allocation6 + $0x18] sm:$0xff]  ;;  %v1187_v3 = vld [vmem:[#allocation6 + $0x10] sm:$0xff] }
 0x441   :  { %v978_v39 = vmul.f32 0.5, %v1352_v1  ;;  %1355 = vtanh.f32 %v970_v58  ;;  %v1186_v58 = vld [vmem:[#allocation6 + $0x8] sm:$0xff]  ;;  %v1185_v1 = vld [vmem:[#allocation6] sm:$0xff] }
 0x442   :  { %v977_v55 = vadd.f32 0.5, %v976_v32 }
 0x443   :  { %v979_v42 = vadd.f32 0.5, %v978_v39 }
 0x445   :  { %v982_v13 = vmul.f32 %v979_v42, %v2478_v28 }
 0x446   :  { %v1354_v33 = vpop.eup %1353 }
 0x447   :  { %v983_v34 = vmul.f32 %v1354_v33, %v977_v55  ;;  %v1356_v36 = vpop.eup %1355 }
 0x448   :  { %v980_v61 = vmul.f32 0.5, %v1356_v36 }
 0x449   :  { %v984_v23 = vadd.f32 %v983_v34, %v982_v13 }
 0x44a   :  { %v981_v19 = vadd.f32 0.5, %v980_v61 }
 0x44b   :  { %1357 = vtanh.f32 %v984_v23 }
 0x451   :  { %v1358_v38 = vpop.eup %1357 }
 0x452   :  { %v986_v37 = vmul.f32 %v1358_v38, %v981_v19 }
 0x454   :  { %1007 = vmatmul.f32.vlgmr.msrb.gmra.mxu0 %v986_v37  ;;  %1027 = vmatmul.f32.vlgmr.msra.gmra.mxu1 %v986_v37 }
 0x455   :  { %1047 = vmatmul.f32.vlgmr.msra.gmra.mxu2 %v986_v37  ;;  %1067 = vmatmul.f32.vlgmr.msra.gmra.mxu3 %v986_v37 }
 0x456   :  { %1205 = vmatpush.msrb.mxu0 %v1200_v15 }
 0x458   :  { %1206 = vmatpush.msrb.mxu0 %v1199_v50 }
 0x45a   :  { %1207 = vmatpush.msrb.mxu0 %v1198_v51 }
 0x45c   :  { %1208 = vmatpush.msrb.mxu0 %v1197_v53 }
 0x45e   :  { %1209 = vmatpush.msrb.mxu0 %v1196_v56 }
 0x460   :  { %1210 = vmatpush.msrb.mxu0 %v1195_v16 }
 0x462   :  { %1211 = vmatpush.msrb.mxu0 %v1194_v24 }
 0x464   :  { %1212 = vmatpush.msrb.mxu0 %v1193_v10 }
 0x466   :  { %1213 = vmatpush.msrb.mxu0 %v1192_v14 }
 0x468   :  { %1214 = vmatpush.msrb.mxu0 %v1191_v60 }
 0x46a   :  { %1215 = vmatpush.msrb.mxu0 %v1190_v29 }
 0x46c   :  { %1216 = vmatpush.msrb.mxu0 %v1189_v52 }
 0x46e   :  { %1217 = vmatpush.msrb.mxu0 %v1188_v54 }
 0x470   :  { %1218 = vmatpush.msrb.mxu0 %v1187_v3 }
 0x472   :  { %1219 = vmatpush.msrb.mxu0 %v1186_v58 }
 0x474   :  { %1220 = vmatpush.msrb.mxu0 %v1185_v1 }
 0x4d1   :  { %v1008_v28 = vpop.f32.mrf.mxu0  ;;  %v1028_v5 = vpop.f32.mrf.mxu1 }
 0x4d2   :  { %v1009_v2 = vadd.f32 %v1008_v28, %v142_v8  ;;  %v1029_v30 = vadd.f32 %v1028_v5, %v183_v0 }
 0x4d4   :  { %1359 = vtanh.f32 %v1009_v2 }
 0x4d5   :  { %1361 = vtanh.f32 %v1029_v30 }
 0x4d8   :  { %v1048_v4 = vpop.f32.mrf.mxu2  ;;  %v1068_v7 = vpop.f32.mrf.mxu3 }
 0x4d9   :  { %v1049_v9 = vadd.f32 %v1048_v4, %v224_v35  ;;  %v1069_v12 = vadd.f32 %v1068_v7, %v265_v62 }
 0x4da   :  { %v1360_v11 = vpop.eup %1359 }
 0x4db   :  { %v1362_v17 = vpop.eup %1361  ;;  %1363 = vtanh.f32 %v1049_v9  ;;  %v1075_v18 = vmul.f32 0.5, %v1360_v11 }
 0x4dc   :  { %v1077_v20 = vmul.f32 0.5, %v1362_v17  ;;  %1365 = vtanh.f32 %v1069_v12 }
 0x4dd   :  { %v1076_v22 = vadd.f32 0.5, %v1075_v18 }
 0x4de   :  { %v1078_v21 = vadd.f32 0.5, %v1077_v20 }
 0x4e0   :  { %v1081_v26 = vmul.f32 %v1078_v21, %v984_v23 }
 0x4e1   :  { %v1364_v25 = vpop.eup %1363 }
 0x4e2   :  { %v1082_v40 = vmul.f32 %v1364_v25, %v1076_v22  ;;  %v1366_v41 = vpop.eup %1365 }
 0x4e3   :  { %v1079_v44 = vmul.f32 0.5, %v1366_v41 }
 0x4e4   :  { %v1083_v43 = vadd.f32 %v1082_v40, %v1081_v26 }
 0x4e5   :  { %v1080_v46 = vadd.f32 0.5, %v1079_v44 }
 0x4e6   :  { %1367 = vtanh.f32 %v1083_v43 }
 0x4ec   :  { %v1368_v47 = vpop.eup %1367 }
 0x4ed   :  { %v1085_v49 = vmul.f32 %v1368_v47, %v1080_v46 }
 0x4ef   :  { %1106 = vmatmul.f32.vlgmr.msra.gmra.mxu0 %v1085_v49  ;;  %1126 = vmatmul.f32.vlgmr.msrb.gmra.mxu1 %v1085_v49 }
 0x4f0   :  { %1146 = vmatmul.f32.vlgmr.msrb.gmra.mxu2 %v1085_v49  ;;  %1166 = vmatmul.f32.vlgmr.msrb.gmra.mxu3 %v1085_v49 }
 0x56c   :  { %v1107_v32 = vpop.f32.mrf.mxu0  ;;  %v1127_v39 = vpop.f32.mrf.mxu1 }
 0x56d   :  { %v1108_v42 = vadd.f32 %v1107_v32, %v2875_v45  ;;  %v1128_v55 = vadd.f32 %v1127_v39, %v2877_v48 }
 0x56f   :  { %1369 = vtanh.f32 %v1108_v42 }
 0x570   :  { %1371 = vtanh.f32 %v1128_v55 }
 0x573   :  { %v1147_v33 = vpop.f32.mrf.mxu2  ;;  %v1167_v13 = vpop.f32.mrf.mxu3 }
 0x574   :  { %v1148_v34 = vadd.f32 %v1147_v33, %v2751_v63  ;;  %v1168_v23 = vadd.f32 %v1167_v13, %v2752_v57  ;;  %v1288_v57 = vld [vmem:[%s2577_s5] ss:$0 sm:$0xff] }
 0x575   :  { %v1370_v36 = vpop.eup %1369 }
 0x576   :  { %v1372_v61 = vpop.eup %1371  ;;  %1373 = vtanh.f32 %v1148_v34  ;;  %v1174_v19 = vmul.f32 0.5, %v1370_v36 }
 0x577   :  { %v1176_v38 = vmul.f32 0.5, %v1372_v61  ;;  %1375 = vtanh.f32 %v1168_v23 }
 0x578   :  { %v1175_v27 = vadd.f32 0.5, %v1174_v19 }
 0x579   :  { %v1177_v37 = vadd.f32 0.5, %v1176_v38 }
 0x57b   :  { %v1180_v45 = vmul.f32 %v1177_v37, %v1083_v43 }
 0x57c   :  { %v1374_v8 = vpop.eup %1373 }
 0x57d   :  { %v1181_v31 = vmul.f32 %v1374_v8, %v1175_v27  ;;  %v1376_v48 = vpop.eup %1375 }
 0x57e   :  { %v1178_v15 = vmul.f32 0.5, %v1376_v48 }
 0x57f   :  { %v1182_v0 = vadd.f32 %v1181_v31, %v1180_v45 }
 0x580   :  { %v1179_v28 = vadd.f32 0.5, %v1178_v15 }
 0x581   :  { %1377 = vtanh.f32 %v1182_v0 }
 0x587   :  { %v1378_v5 = vpop.eup %1377 }
 0x588   :  { %v1184_v63 = vmul.f32 %v1378_v5, %v1179_v28 }
 0x58a   :  { %1221 = vmatmul.f32.vlgmr.msrb.gmra.mxu0 %v1184_v63 }
 0x607   :  { %v1222_v2 = vpop.f32.mrf.mxu0 }
 0x608   :  { %v1223_v30 = vadd.f32 %v1288_v57, %v1222_v2 }
 0x60a   :  { %1225 = vst [vmem:[#allocation8] sm:$0xff] %v1223_v30 }
 0x60b   :  { %1236 = dma.vmem_to_hbm [thread:$0]  %s1232_s3, 128, %s1234_s12, [#allocation5]  }
 0x60c   :  { %1519 = dma.done.wait [#allocation5], 128  }
 0x60d   :  { %1520 = vsyncadd [#allocation5], 4294967168 }
 0x60e   :  { %1241 = vsyncpa [#allocation4], 1 }
 0x60f   :  { %1242 = vsyncpa [#allocation7], 1 }
 0x610   :  { %1243 = vsyncpa [#allocation5], 1 }

</bundles_post_ra>
